<compile_context>
chip_gen: v7x
topology: tpu7x:2x2x1
jax: 0.10.0
libtpu: 0.0.40
codegen_flags: <defaults>
</compile_context>

<pallas_src>
import functools
import math

import jax
import jax.numpy as jnp
from jax.experimental import pallas as pl
from jax.experimental.pallas import tpu as pltpu


def _round_up(x, m):
    return (x + m - 1) // m * m


def _vmem_capacity_bytes():
    """Physical VMEM of the local TPU generation (conservative fallback)."""
    try:
        info = pltpu.get_tpu_info()
        cap = int(getattr(info, "vmem_capacity_bytes", 0))
        if cap > 0:
            return cap
    except Exception:
        pass
    return 64 << 20  # v7x-sized fallback; v5e/v6e actually have 128 MiB.


def _conv_bn_relu_kernel(x_ref, w_ref, shift_ref, o_ref, *,
                         K, stride, dilation, TH, W_out_p):
    """One (image, row-band) step of Conv2d(bias=False) + BN(eval) + ReLU.

    x_ref:     (1, 1, s*s, TH_ph, Wq, Cin_p)  bf16 phase-decomposed input band
    w_ref:     (K*K*Cin_p, Cout_p)            bf16 weights (BN scale folded in)
    shift_ref: (1, Cout_p)                    f32 BN shift
    o_ref:     (1, 1, TH*W_out_p, Cout_p)     output slab for this band
    """
    s = stride
    Cin_p = x_ref.shape[-1]

    # im2col: concatenate the K*K lane-aligned taps so the whole conv becomes a
    # single MXU matmul with contraction depth K*K*Cin_p.
    taps = []
    for ky in range(K):
        qy, ry = divmod(ky * dilation, s)
        for kx in range(K):
            qx, rx = divmod(kx * dilation, s)
            patch = x_ref[0, 0, ry * s + rx,
                          pl.ds(qy, TH), pl.ds(qx, W_out_p), :]
            # W_out_p % 8 == 0 and Cin_p % 128 == 0 => pure re-indexing, not a
            # relayout.
            taps.append(patch.reshape(TH * W_out_p, Cin_p))
    lhs = taps[0] if len(taps) == 1 else jnp.concatenate(taps, axis=-1)

    # bf16 x bf16 -> f32 accumulation (native MXU path).
    acc = jnp.dot(lhs, w_ref[...], preferred_element_type=jnp.float32)
    y = jnp.maximum(acc + shift_ref[...], 0.0)        # fused BN shift + ReLU
    o_ref[0, 0] = y.astype(o_ref.dtype)


def basic_conv2d_forward(x, weight, gamma, beta, running_mean, running_var, *,
                         stride=1, padding=0, dilation=1, eps=1e-5,
                         block_h=None):
    """BasicConv2d forward (eval-mode BN). x: (N,Cin,H,W); weight: (Cout,Cin,K,K)."""
    N, Cin, H, W = x.shape
    Cout, Cin_w, K, K2 = weight.shape
    assert Cin_w == Cin and K == K2
    s, d, p = int(stride), int(dilation), int(padding)

    H_out = (H + 2 * p - d * (K - 1) - 1) // s + 1
    W_out = (W + 2 * p - d * (K - 1) - 1) // s + 1
    assert H_out > 0 and W_out > 0

    # Lane/sublane-friendly padded sizes.
    Cin_p = _round_up(Cin, 128)
    Cout_p = _round_up(Cout, 128)
    W_out_p = _round_up(W_out, 8)

    q_max = (d * (K - 1)) // s          # halo rows/cols in phase space
    Wq = W_out_p + q_max                # phase-space width per band

    out_dtype = x.dtype
    out_isz = jnp.dtype(out_dtype).itemsize

    # ---- choose the row-band height TH from the per-generation VMEM budget.
    cap = _vmem_capacity_bytes()
    budget = int(cap * 0.7)
    w_bytes = K * K * Cin_p * Cout_p * 2
    shift_bytes = Cout_p * 4
    const_bytes = 2 * (w_bytes + shift_bytes) + 2 * s * s * q_max * Wq * Cin_p * 2
    row_bytes = (2 * s * s * Wq * Cin_p * 2           # double-buffered input rows
                 + 2 * W_out_p * Cout_p * out_isz     # double-buffered output rows
                 + W_out_p * K * K * Cin_p * 2        # im2col value (bf16)
                 + W_out_p * Cout_p * 4)              # f32 accumulator value
    if block_h is not None:
        TH = max(1, min(int(block_h), H_out))
    else:
        TH = max(1, min(H_out, (budget - const_bytes) // row_bytes))
        if 8 < TH < H_out:
            TH = (TH // 8) * 8
        # TODO(synk): if even TH == 1 overflows the budget (huge W images),
        # additionally tile the W axis.
    n_bands = -(-H_out // TH)
    TH_ph = TH + q_max

    est = const_bytes + TH * row_bytes
    vmem_limit = int(min(max(est * 5 // 4, 32 << 20), int(cap * 0.9)))

    # ---- fold BatchNorm (eval mode) into the weights + a per-channel shift.
    # TODO(synk): training-mode BatchNorm (batch statistics + running-stat
    # updates) is not implemented; eval-mode running statistics are used.
    inv_std = 1.0 / jnp.sqrt(running_var.astype(jnp.float32) + eps)
    scale = gamma.astype(jnp.float32) * inv_std                       # (Cout,)
    shift = beta.astype(jnp.float32) - running_mean.astype(jnp.float32) * scale

    w_hwio = jnp.transpose(weight.astype(jnp.float32), (2, 3, 1, 0))  # (K,K,Cin,Cout)
    w_hwio = w_hwio * scale[None, None, None, :]                      # fold BN scale
    w_p = jnp.pad(w_hwio, ((0, 0), (0, 0), (0, Cin_p - Cin), (0, Cout_p - Cout)))
    w_mat = w_p.reshape(K * K * Cin_p, Cout_p).astype(jnp.bfloat16)   # tap-major rows
    shift_p = jnp.pad(shift, (0, Cout_p - Cout)).reshape(1, Cout_p)

    # ---- input: NHWC bf16, conv padding + exact band/phase geometry.
    H_tot = (n_bands * TH + q_max) * s
    W_tot = Wq * s
    x_nhwc = jnp.transpose(x, (0, 2, 3, 1)).astype(jnp.bfloat16)
    xc = jnp.pad(x_nhwc,
                 ((0, 0),
                  (p, max(0, H_tot - (H + p))),
                  (p, max(0, W_tot - (W + p))),
                  (0, Cin_p - Cin)))[:, :H_tot, :W_tot, :]

    # Row bands (halo rows duplicated across bands so BlockSpecs stay disjoint).
    if n_bands == 1:
        xb = xc[:, None]                                    # (N,1,TH_ph*s,W_tot,Cin_p)
    else:
        row_ids = (jnp.arange(n_bands) * (TH * s))[:, None] \
            + jnp.arange(TH_ph * s)[None, :]
        xb = xc[:, row_ids]                                 # (N,nb,TH_ph*s,W_tot,Cin_p)
    # Phase (space-to-depth) decomposition: stride>1 needs no strided loads.
    if s == 1:
        xb = xb[:, :, None]                                 # (N,nb,1,TH_ph,Wq,Cin_p)
    else:
        xb = xb.reshape(N, n_bands, TH_ph, s, Wq, s, Cin_p)
        xb = jnp.transpose(xb, (0, 1, 3, 5, 2, 4, 6))
        xb = xb.reshape(N, n_bands, s * s, TH_ph, Wq, Cin_p)

    kernel = functools.partial(_conv_bn_relu_kernel, K=K, stride=s, dilation=d,
                               TH=TH, W_out_p=W_out_p)

    flops = 2 * N * n_bands * TH * W_out_p * (K * K * Cin_p) * Cout_p
    bytes_accessed = (xb.size * 2 + w_mat.size * 2 + shift_p.size * 4
                      + N * n_bands * TH * W_out_p * Cout_p * out_isz)
    cost = pl.CostEstimate(flops=flops, transcendentals=0,
                           bytes_accessed=bytes_accessed)

    # TODO(synk): single-buffer the grid-invariant weight/shift blocks
    # (pipeline_mode=pl.Buffered(1)) once that path is verified; they only cost
    # VMEM when double buffered.
    out = pl.pallas_call(
        kernel,
        out_shape=jax.ShapeDtypeStruct((N, n_bands, TH * W_out_p, Cout_p),
                                       out_dtype),
        grid_spec=pltpu.PrefetchScalarGridSpec(
            num_scalar_prefetch=0,
            grid=(N, n_bands),
            in_specs=[
                pl.BlockSpec((1, 1, s * s, TH_ph, Wq, Cin_p),
                             lambda n, b: (n, b, 0, 0, 0, 0)),
                pl.BlockSpec((K * K * Cin_p, Cout_p), lambda n, b: (0, 0)),
                pl.BlockSpec((1, Cout_p), lambda n, b: (0, 0)),
            ],
            out_specs=pl.BlockSpec((1, 1, TH * W_out_p, Cout_p),
                                   lambda n, b: (n, b, 0, 0)),
        ),
        compiler_params=pltpu.CompilerParams(
            dimension_semantics=("parallel", "parallel"),
            vmem_limit_bytes=vmem_limit),
        cost_estimate=cost,
    )(xb, w_mat, shift_p)

    out = out.reshape(N, n_bands * TH, W_out_p, Cout_p)[:, :H_out, :W_out, :Cout]
    return jnp.transpose(out, (0, 3, 1, 2))                 # back to NCHW


def _reference(x, weight, gamma, beta, running_mean, running_var, *,
               stride, padding, dilation, eps, use_bf16):
    """XLA reference: conv + eval-mode BN + ReLU (optionally bf16-consistent)."""
    scale = gamma / jnp.sqrt(running_var + eps)
    shift = beta - running_mean * scale
    w = weight * scale[:, None, None, None]
    lhs, rhs = x, w
    kwargs = {}
    if use_bf16:
        lhs = lhs.astype(jnp.bfloat16)
        rhs = rhs.astype(jnp.bfloat16)
    else:
        kwargs["precision"] = jax.lax.Precision.HIGHEST
    conv = jax.lax.conv_general_dilated(
        lhs, rhs, window_strides=(stride, stride),
        padding=((padding, padding), (padding, padding)),
        rhs_dilation=(dilation, dilation),
        dimension_numbers=("NCHW", "OIHW", "NCHW"),
        preferred_element_type=jnp.float32, **kwargs)
    return jnp.maximum(conv + shift[None, :, None, None], 0.0)


if __name__ == "__main__":
    eps = 1e-5
    configs = [
        # (N, Cin, H, W, Cout, K, stride, padding, dilation, block_h)
        (2, 4, 16, 16, 8, 3, 1, 1, 1, 8),      # multi-band path (2 row bands)
        (1, 3, 17, 17, 10, 3, 2, 1, 1, None),  # stride-2 (phase-decomposed) path
        (1, 5, 12, 12, 6, 3, 1, 2, 2, None),   # dilated-conv path
    ]
    key = jax.random.PRNGKey(0)
    for idx, (N, Cin, H, W, Cout, K, stride, padding, dilation,
              block_h) in enumerate(configs):
        key, kx_, kw_, kg_, kb_, km_, kv_ = jax.random.split(key, 7)
        x = jax.random.normal(kx_, (N, Cin, H, W), dtype=jnp.float32)
        fan_in = Cin * K * K
        bound = 1.0 / math.sqrt(fan_in)        # kaiming_uniform_(a=sqrt(5)) bound
        weight = jax.random.uniform(kw_, (Cout, Cin, K, K), jnp.float32,
                                    -bound, bound)
        gamma = jax.random.uniform(kg_, (Cout,), jnp.float32, 0.5, 1.5)
        beta = 0.1 * jax.random.normal(kb_, (Cout,), jnp.float32)
        running_mean = 0.1 * jax.random.normal(km_, (Cout,), jnp.float32)
        running_var = jax.random.uniform(kv_, (Cout,), jnp.float32, 0.5, 1.5)

        y = basic_conv2d_forward(x, weight, gamma, beta, running_mean,
                                 running_var, stride=stride, padding=padding,
                                 dilation=dilation, eps=eps, block_h=block_h)
        y = jax.block_until_ready(y)

        H_out = (H + 2 * padding - dilation * (K - 1) - 1) // stride + 1
        W_out = (W + 2 * padding - dilation * (K - 1) - 1) // stride + 1
        assert y.shape == (N, Cout, H_out, W_out), f"config {idx}: bad shape"

        # Tight check against a bf16-consistent reference (same MXU dtype path).
        y_bf16 = _reference(x, weight, gamma, beta, running_mean, running_var,
                            stride=stride, padding=padding, dilation=dilation,
                            eps=eps, use_bf16=True)
        assert jnp.allclose(y, y_bf16, atol=5e-3, rtol=5e-3), \
            f"config {idx}: mismatch vs bf16 reference"

        # Loose sanity check against the pure f32 module semantics.
        y_f32 = _reference(x, weight, gamma, beta, running_mean, running_var,
                           stride=stride, padding=padding, dilation=dilation,
                           eps=eps, use_bf16=False)
        assert jnp.allclose(y, y_f32, atol=3e-2, rtol=3e-2), \
            f"config {idx}: mismatch vs f32 reference"

    print("KERNEL_OK")
</pallas_src>

<mosaic_0001>
module attributes {stable_mosaic.version = 11 : i64} {
  func.func @_conv_bn_relu_kernel(%arg0: i32, %arg1: i32, %arg2: memref<1x1x1x10x18x128xbf16, #tpu.memory_space<vmem>>, %arg3: memref<1152x128xbf16, #tpu.memory_space<vmem>>, %arg4: memref<1x128xf32, #tpu.memory_space<vmem>>, %arg5: memref<1x1x128x128xf32, #tpu.memory_space<vmem>>) attributes {dimension_semantics = [#tpu.dimension_semantics<parallel>, #tpu.dimension_semantics<parallel>], iteration_bounds = array<i64: 2, 2>, scalar_prefetch = 0 : i64, scratch_operands = 0 : i64, tpu.core_type = #tpu.core_type<tc>, window_params = [{transform_indices = @transform_0, window_bounds = array<i64: 1, 1, 1, 10, 18, 128>}, {pipeline_mode = #tpu.pipeline_mode<synchronous>, transform_indices = @transform_1, window_bounds = array<i64: 1152, 128>}, {pipeline_mode = #tpu.pipeline_mode<synchronous>, transform_indices = @transform_2, window_bounds = array<i64: 1, 128>}, {transform_indices = @transform_3, window_bounds = array<i64: 1, 1, 128, 128>}]} {
    %c0 = arith.constant 0 : index
    %c0_0 = arith.constant 0 : index
    %c0_1 = arith.constant 0 : index
    %c0_2 = arith.constant 0 : index
    %c0_3 = arith.constant 0 : index
    %c0_4 = arith.constant 0 : index
    %0 = vector.load %arg2[%c0, %c0_0, %c0_1, %c0_2, %c0_3, %c0_4] : memref<1x1x1x10x18x128xbf16, #tpu.memory_space<vmem>>, vector<1x1x1x8x16x128xbf16>
    %1 = vector.shape_cast %0 : vector<1x1x1x8x16x128xbf16> to vector<8x16x128xbf16>
    %2 = vector.shape_cast %1 : vector<8x16x128xbf16> to vector<128x128xbf16>
    %c0_5 = arith.constant 0 : index
    %c0_6 = arith.constant 0 : index
    %c0_7 = arith.constant 0 : index
    %c0_8 = arith.constant 0 : index
    %c1 = arith.constant 1 : index
    %c0_9 = arith.constant 0 : index
    %3 = vector.load %arg2[%c0_5, %c0_6, %c0_7, %c0_8, %c1, %c0_9] : memref<1x1x1x10x18x128xbf16, #tpu.memory_space<vmem>>, vector<1x1x1x8x16x128xbf16>
    %4 = vector.shape_cast %3 : vector<1x1x1x8x16x128xbf16> to vector<8x16x128xbf16>
    %5 = vector.shape_cast %4 : vector<8x16x128xbf16> to vector<128x128xbf16>
    %c0_10 = arith.constant 0 : index
    %c0_11 = arith.constant 0 : index
    %c0_12 = arith.constant 0 : index
    %c0_13 = arith.constant 0 : index
    %c2 = arith.constant 2 : index
    %c0_14 = arith.constant 0 : index
    %6 = vector.load %arg2[%c0_10, %c0_11, %c0_12, %c0_13, %c2, %c0_14] : memref<1x1x1x10x18x128xbf16, #tpu.memory_space<vmem>>, vector<1x1x1x8x16x128xbf16>
    %7 = vector.shape_cast %6 : vector<1x1x1x8x16x128xbf16> to vector<8x16x128xbf16>
    %8 = vector.shape_cast %7 : vector<8x16x128xbf16> to vector<128x128xbf16>
    %c0_15 = arith.constant 0 : index
    %c0_16 = arith.constant 0 : index
    %c0_17 = arith.constant 0 : index
    %c1_18 = arith.constant 1 : index
    %c0_19 = arith.constant 0 : index
    %c0_20 = arith.constant 0 : index
    %9 = vector.load %arg2[%c0_15, %c0_16, %c0_17, %c1_18, %c0_19, %c0_20] : memref<1x1x1x10x18x128xbf16, #tpu.memory_space<vmem>>, vector<1x1x1x8x16x128xbf16>
    %10 = vector.shape_cast %9 : vector<1x1x1x8x16x128xbf16> to vector<8x16x128xbf16>
    %11 = vector.shape_cast %10 : vector<8x16x128xbf16> to vector<128x128xbf16>
    %c0_21 = arith.constant 0 : index
    %c0_22 = arith.constant 0 : index
    %c0_23 = arith.constant 0 : index
    %c1_24 = arith.constant 1 : index
    %c1_25 = arith.constant 1 : index
    %c0_26 = arith.constant 0 : index
    %12 = vector.load %arg2[%c0_21, %c0_22, %c0_23, %c1_24, %c1_25, %c0_26] : memref<1x1x1x10x18x128xbf16, #tpu.memory_space<vmem>>, vector<1x1x1x8x16x128xbf16>
    %13 = vector.shape_cast %12 : vector<1x1x1x8x16x128xbf16> to vector<8x16x128xbf16>
    %14 = vector.shape_cast %13 : vector<8x16x128xbf16> to vector<128x128xbf16>
    %c0_27 = arith.constant 0 : index
    %c0_28 = arith.constant 0 : index
    %c0_29 = arith.constant 0 : index
    %c1_30 = arith.constant 1 : index
    %c2_31 = arith.constant 2 : index
    %c0_32 = arith.constant 0 : index
    %15 = vector.load %arg2[%c0_27, %c0_28, %c0_29, %c1_30, %c2_31, %c0_32] : memref<1x1x1x10x18x128xbf16, #tpu.memory_space<vmem>>, vector<1x1x1x8x16x128xbf16>
    %16 = vector.shape_cast %15 : vector<1x1x1x8x16x128xbf16> to vector<8x16x128xbf16>
    %17 = vector.shape_cast %16 : vector<8x16x128xbf16> to vector<128x128xbf16>
    %c0_33 = arith.constant 0 : index
    %c0_34 = arith.constant 0 : index
    %c0_35 = arith.constant 0 : index
    %c2_36 = arith.constant 2 : index
    %c0_37 = arith.constant 0 : index
    %c0_38 = arith.constant 0 : index
    %18 = vector.load %arg2[%c0_33, %c0_34, %c0_35, %c2_36, %c0_37, %c0_38] : memref<1x1x1x10x18x128xbf16, #tpu.memory_space<vmem>>, vector<1x1x1x8x16x128xbf16>
    %19 = vector.shape_cast %18 : vector<1x1x1x8x16x128xbf16> to vector<8x16x128xbf16>
    %20 = vector.shape_cast %19 : vector<8x16x128xbf16> to vector<128x128xbf16>
    %c0_39 = arith.constant 0 : index
    %c0_40 = arith.constant 0 : index
    %c0_41 = arith.constant 0 : index
    %c2_42 = arith.constant 2 : index
    %c1_43 = arith.constant 1 : index
    %c0_44 = arith.constant 0 : index
    %21 = vector.load %arg2[%c0_39, %c0_40, %c0_41, %c2_42, %c1_43, %c0_44] : memref<1x1x1x10x18x128xbf16, #tpu.memory_space<vmem>>, vector<1x1x1x8x16x128xbf16>
    %22 = vector.shape_cast %21 : vector<1x1x1x8x16x128xbf16> to vector<8x16x128xbf16>
    %23 = vector.shape_cast %22 : vector<8x16x128xbf16> to vector<128x128xbf16>
    %c0_45 = arith.constant 0 : index
    %c0_46 = arith.constant 0 : index
    %c0_47 = arith.constant 0 : index
    %c2_48 = arith.constant 2 : index
    %c2_49 = arith.constant 2 : index
    %c0_50 = arith.constant 0 : index
    %24 = vector.load %arg2[%c0_45, %c0_46, %c0_47, %c2_48, %c2_49, %c0_50] : memref<1x1x1x10x18x128xbf16, #tpu.memory_space<vmem>>, vector<1x1x1x8x16x128xbf16>
    %25 = vector.shape_cast %24 : vector<1x1x1x8x16x128xbf16> to vector<8x16x128xbf16>
    %26 = vector.shape_cast %25 : vector<8x16x128xbf16> to vector<128x128xbf16>
    %27 = tpu.concatenate %2, %5, %8, %11, %14, %17, %20, %23, %26 in 1 : vector<128x128xbf16>, vector<128x128xbf16>, vector<128x128xbf16>, vector<128x128xbf16>, vector<128x128xbf16>, vector<128x128xbf16>, vector<128x128xbf16>, vector<128x128xbf16>, vector<128x128xbf16> -> vector<128x1152xbf16>
    %c0_51 = arith.constant 0 : index
    %c0_52 = arith.constant 0 : index
    %28 = vector.load %arg3[%c0_51, %c0_52] : memref<1152x128xbf16, #tpu.memory_space<vmem>>, vector<1152x128xbf16>
    %cst = arith.constant dense<0.000000e+00> : vector<128x128xf32>
    %29 = tpu.matmul %27, %28, %cst {dimension_numbers = #tpu.dot_dimension_numbers<[1], [0], [0], [1], [0, 0, 1, 1], [], []>} : vector<128x1152xbf16>, vector<1152x128xbf16>, vector<128x128xf32> -> vector<128x128xf32>
    %c0_53 = arith.constant 0 : index
    %c0_54 = arith.constant 0 : index
    %30 = vector.load %arg4[%c0_53, %c0_54] : memref<1x128xf32, #tpu.memory_space<vmem>>, vector<1x128xf32>
    %31 = vector.broadcast %30 : vector<1x128xf32> to vector<128x128xf32>
    %32 = arith.addf %29, %31 : vector<128x128xf32>
    %cst_55 = arith.constant 0.000000e+00 : f32
    %33 = vector.broadcast %cst_55 : f32 to vector<128x128xf32>
    %34 = arith.maximumf %32, %33 : vector<128x128xf32>
    %c0_56 = arith.constant 0 : index
    %c0_57 = arith.constant 0 : index
    %c0_58 = arith.constant 0 : index
    %c0_59 = arith.constant 0 : index
    %35 = vector.load %arg5[%c0_56, %c0_57, %c0_58, %c0_59] : memref<1x1x128x128xf32, #tpu.memory_space<vmem>>, vector<1x1x128x128xf32>
    %36 = vector.shape_cast %35 : vector<1x1x128x128xf32> to vector<128x128xf32>
    %37 = vector.shape_cast %34 : vector<128x128xf32> to vector<1x1x128x128xf32>
    tpu.vector_store %arg5[%c0_56, %c0_57, %c0_58, %c0_59], %37 {strides = array<i32>} : memref<1x1x128x128xf32, #tpu.memory_space<vmem>>, vector<1x1x128x128xf32>,
    return
  }
  func.func @transform_0(%arg0: i32, %arg1: i32) -> (i32, i32, i32, i32, i32, i32) {
    %c0_i32 = arith.constant 0 : i32
    %c0_i32_0 = arith.constant 0 : i32
    %c0_i32_1 = arith.constant 0 : i32
    %c0_i32_2 = arith.constant 0 : i32
    %c0_i32_3 = arith.constant 0 : i32
    return %arg0, %arg1, %c0_i32, %c0_i32_0, %c0_i32_1, %c0_i32_2 : i32, i32, i32, i32, i32, i32
  }
  func.func @transform_1(%arg0: i32, %arg1: i32) -> (i32, i32) {
    %c0_i32 = arith.constant 0 : i32
    %c0_i32_0 = arith.constant 0 : i32
    %c0_i32_1 = arith.constant 0 : i32
    return %c0_i32, %c0_i32_0 : i32, i32
  }
  func.func @transform_2(%arg0: i32, %arg1: i32) -> (i32, i32) {
    %c0_i32 = arith.constant 0 : i32
    %c0_i32_0 = arith.constant 0 : i32
    %c0_i32_1 = arith.constant 0 : i32
    return %c0_i32, %c0_i32_0 : i32, i32
  }
  func.func @transform_3(%arg0: i32, %arg1: i32) -> (i32, i32, i32, i32) {
    %c0_i32 = arith.constant 0 : i32
    %c0_i32_0 = arith.constant 0 : i32
    %c0_i32_1 = arith.constant 0 : i32
    return %arg0, %arg1, %c0_i32, %c0_i32_0 : i32, i32, i32, i32
  }
}

</mosaic_0001>

<bundles_post_ra>
// kernel: tpu_custom_call.1
= control target key start
LH: loop header
LB: loop body
LE: loop exit
PB: predicated region body
PF: predicated region fallthrough
CT: control target
= control target key end

     0   :  { %8 = vsyncpa [#allocation3], 0  ;;  %s4702_s0 = inlined_call_operand.vmem [shape: bf16[2,2,1,10,18,128], index: 0, kind: input, shape index: {}]   ;;  %s4703_s1 = inlined_call_operand.vmem [shape: bf16[1152,128], index: 1, kind: input, shape index: {}]   ;;  %s4704_s2 = inlined_call_operand.vmem [shape: f32[1,128], index: 2, kind: input, shape index: {}]   ;;  %s4705_s3 = inlined_call_operand.hbm [shape: f32[2,2,128,128], index: 3, kind: output, shape index: {}]  }
   0x1   :  { %10 = vsyncpa [#allocation3 + $0x1], 0  ;;  %s3487_s12 = smov 0   ;;  %s3489_s13 = smov 0  }
   0x2   :  { %s3491_s14 = smov 0   ;;  %s3493_s15 = smov 0  }
   0x3   :  { %s3495_s16 = smov 0   ;;  %s3497_s17 = smov 0  }
   0x4   :  { %s3499_s18 = smov 0   ;;  %s3501_s19 = smov 0  }
   0x5 LB: > { %s2631_s20 = sadd.s32 4294967295, %s3462_s19   ;;  %s2632_s21 = sadd.s32 4294967294, %s3462_s19   ;;  %s3462_s19 = sphi %s3501_s19, %s16_s19   ;;  %s3458_s18 = sphi %s3499_s18, %s4722_s18   ;;  %s3454_s17 = sphi %s3497_s17, %s4721_s17   ;;  %s3450_s16 = sphi %s3495_s16, %s4720_s16   ;;  %s3446_s15 = sphi %s3493_s15, %s4719_s15   ;;  %s3442_s14 = sphi %s3491_s14, %s4718_s14   ;;  %s3438_s13 = sphi %s3489_s13, %s4717_s13   ;;  %s3434_s12 = sphi %s3487_s12, %s4716_s12  }
   0x6   : > { %s25_s22 = sadd.s32 1, %s3454_s17  ;;  %s28_s23 = sadd.s32 1, %s3458_s18 }
   0x7   : > { %p26_p0 = scmp.ge.s32.totalorder %s25_s22, 2  ;;  %p117_p1 = scmp.ne.s32.totalorder %s3442_s14, %s3438_s13 }
   0x8   : > { %p118_p2 = scmp.eq.s32.totalorder %s2631_s20, 3  ;;  %p123_p5 = scmp.ne.s32.totalorder %s3438_s13, %s3434_s12 }
   0x9   : > { %s4724_s22 = smov (%p26_p0, %s25_s22), 0  ;;  %s4726_s23 = smov (!%p26_p0, %s28_s23), %s3458_s18 }
   0xa   : > { %s103_s24 = ssub.s32 %s3454_s17, %s4724_s22  ;;  %p3538_p3 = por %p118_p2, %p117_p1 }
   0xb   : > { %p30_p4 = scmp.ge.s32.totalorder %s4726_s23, 2  ;;  %p124_p6 = scmp.eq.s32.totalorder %s2632_s21, 3 }
   0xc   : > { %p2635_p7 = scmp.ge.s32.totalorder %s3462_s19, 1  ;;  %p160_p9 = scmp.lt.s32.totalorder %s3462_s19, 5 }
   0xd   : > { %s4728_s23 = smov (%p30_p4, %s4726_s23), 0  ;;  %p3547_p8 = por %p124_p6, %p123_p5 }
   0xe   : > { %s102_s27 = ssub.s32 %s3458_s18, %s4728_s23  ;;  %s107_s28 = sadd.s32 1, %s3442_s14 }
   0xf   : > { %s104_s29 = sor.u32 %s103_s24, %s102_s27  ;;  %p161_p10 = pnand %p2635_p7, %p160_p9 }
  0x10   : > { %p105_p11 = scmp.eq.s32.totalorder %s104_s29, 0  ;;  %v3272_v0 = vld [vmem:[%s4703_s1 + $0x40] sm:$0xff] (!%p161_p10)   ;;  %v3276_v4 = vld [vmem:[%s4703_s1 + $0x48] sm:$0xff] (!%p161_p10)   ;;  %v3280_v8 = vld [vmem:[%s4703_s1 + $0x50] sm:$0xff] (!%p161_p10)   ;;  %p188_p12 = scmp.lt.s32.totalorder (!%p161_p10), %s3450_s16, 1  ;;  %vm449_vm2 = vcmask (!%p161_p10), 1042432  }
  0x11   : > { %164 = sbr.rel (%p161_p10) target bundleno = 427 (0x1ab), region = 32  ;;  %v3273_v1 = vld [vmem:[%s4703_s1 + $0xc0] sm:$0xff] (!%p161_p10)   ;;  %2877 = vmatprep.subr.bf16.mxu0 (!%p161_p10), %v3272_v0  ;;  %v3277_v5 = vld [vmem:[%s4703_s1 + $0xc8] sm:$0xff] (!%p161_p10)   ;;  %v3281_v9 = vld [vmem:[%s4703_s1 + $0xd0] sm:$0xff] (!%p161_p10)   ;;  %p190_p13 = scmp.lt.s32.totalorder (!%p161_p10), %s3446_s15, 1  ;;  %vm450_vm3 = vcmask (!%p161_p10), 1046532  }
  0x12   : > { %s3556_s30 = scalar_select %p105_p11, %s3442_s14, %s107_s28  }
  0x13   : > { %v3274_v2 = vld [vmem:[%s4703_s1] sm:$0xff] (!%p161_p10)   ;;  %2941 = vmatprep.subr.bf16.mxu1 (!%p161_p10), %v3273_v1  ;;  %v3278_v6 = vld [vmem:[%s4703_s1 + $0x8] sm:$0xff] (!%p161_p10)   ;;  %v3282_v10 = vld [vmem:[%s4703_s1 + $0x10] sm:$0xff] (!%p161_p10)   ;;  %vm222_vm0 = vsmask.f32 (!%p161_p10), 3328  ;;  %s2873_s24 = sshll.u32 (!%p161_p10), %s3450_s16, 5 }
  0x14   : > { %v3275_v3 = vld [vmem:[%s4703_s1 + $0x80] sm:$0xff] (!%p161_p10)   ;;  %2878 = vmatpush3.bf16.msra.mxu0 (!%p161_p10), %v3274_v2  ;;  %v3279_v7 = vld [vmem:[%s4703_s1 + $0x88] sm:$0xff] (!%p161_p10)   ;;  %v3283_v11 = vld [vmem:[%s4703_s1 + $0x90] sm:$0xff] (!%p161_p10)   ;;  %vm223_vm1 = vsmask.f32 (!%p161_p10), 7440  ;;  %s3464_s20 = smov (!%p161_p10), [#allocation2]  }
  0x15   : > { %2942 = vmatpush3.bf16.msra.mxu1 (!%p161_p10), %v3275_v3  ;;  %2879 = vmatprep.subr.bf16.mxu0 (!%p161_p10), %v3276_v4  ;;  %v3284_v12 = vld [vmem:[%s4703_s1 + $0x58] sm:$0xff] (!%p161_p10)   ;;  %v3288_v16 = vld [vmem:[%s4703_s1 + $0x60] sm:$0xff] (!%p161_p10)   ;;  %v3292_v20 = vld [vmem:[%s4703_s1 + $0x68] sm:$0xff] (!%p161_p10)  }
  0x16   : > { %2943 = vmatprep.subr.bf16.mxu1 (!%p161_p10), %v3277_v5  ;;  %v3285_v13 = vld [vmem:[%s4703_s1 + $0xd8] sm:$0xff] (!%p161_p10)   ;;  %v3289_v17 = vld [vmem:[%s4703_s1 + $0xe0] sm:$0xff] (!%p161_p10)   ;;  %v3293_v21 = vld [vmem:[%s4703_s1 + $0xe8] sm:$0xff] (!%p161_p10)  }
  0x17   : > { %v3286_v14 = vld [vmem:[%s4703_s1 + $0x18] sm:$0xff] (!%p161_p10)   ;;  %v3290_v18 = vld [vmem:[%s4703_s1 + $0x20] sm:$0xff] (!%p161_p10)   ;;  %v3294_v22 = vld [vmem:[%s4703_s1 + $0x28] sm:$0xff] (!%p161_p10)  }
  0x18   : > { %2880 = vmatpush3.bf16.msra.mxu0 %v3278_v6  ;;  %s189_s6 = scalar_select %p188_p12, %s3450_s16, 1  ;;  %v3287_v15 = vld [vmem:[%s4703_s1 + $0x98] sm:$0xff]   ;;  %v3291_v19 = vld [vmem:[%s4703_s1 + $0xa0] sm:$0xff]   ;;  %v3295_v23 = vld [vmem:[%s4703_s1 + $0xa8] sm:$0xff]  }
  0x19   : > { %2944 = vmatpush3.bf16.msra.mxu1 %v3279_v7  ;;  %2881 = vmatprep.subr.bf16.mxu0 %v3280_v8  ;;  %s191_s9 = scalar_select %p190_p13, %s3446_s15, 1  ;;  %v3296_v24 = vld [vmem:[%s4703_s1 + $0x70] sm:$0xff]   ;;  %v3300_v28 = vld [vmem:[%s4703_s1 + $0x78] sm:$0xff]   ;;  %v3306_v54 = vld [vmem:[%s4703_s1 + $0x140] sm:$0xff]  }
  0x1a   : > { %2945 = vmatprep.subr.bf16.mxu1 %v3281_v9  ;;  %s3198_s28 = smul.u32 60, %s189_s6  ;;  %v3297_v25 = vld [vmem:[%s4703_s1 + $0xf0] sm:$0xff]   ;;  %v3301_v29 = vld [vmem:[%s4703_s1 + $0xf8] sm:$0xff]   ;;  %vm3689_vm4 = vmor %vm222_vm0, %vm223_vm1  ;;  %s2872_s6 = sshll.u32 %s3446_s15, 4 }
  0x1b   : > { %s3197_s5 = smul.u32 30, %s191_s9  ;;  %v3298_v26 = vld [vmem:[%s4703_s1 + $0x30] sm:$0xff]   ;;  %v3302_v30 = vld [vmem:[%s4703_s1 + $0x38] sm:$0xff]   ;;  %vm3699_vm5 = vmor %vm449_vm2, %vm450_vm3  ;;  %s4621_s15 = sadd.s32 %s2873_s24, %s2872_s6 }
  0x1c   : > { %2882 = vmatpush3.bf16.msra.mxu0 %v3282_v10  ;;  %v3299_v27 = vld [vmem:[%s4703_s1 + $0xb0] sm:$0xff]   ;;  %v3303_v31 = vld [vmem:[%s4703_s1 + $0xb8] sm:$0xff]   ;;  %v3307_v1 = vld [vmem:[%s4703_s1 + $0x1c0] sm:$0xff]   ;;  %s2874_s16 = sshll.u32 %s4621_s15, 7 }
  0x1d   : > { %2946 = vmatpush3.bf16.msra.mxu1 %v3283_v11  ;;  %2883 = vmatprep.subr.bf16.mxu0 %v3284_v12  ;;  %s194_s9 = sadd.s32 %s3198_s28, %s3197_s5  ;;  %v3308_v9 = vld [vmem:[%s4703_s1 + $0x100] sm:$0xff]   ;;  %s185_s28 = sand.u32 1, %s3438_s13  }
  0x1e   : > { %2947 = vmatprep.subr.bf16.mxu1 %v3285_v13  ;;  %s2637_s11 = sshll.u32 %s194_s9, 2  ;;  %s2636_s5 = sshll.u32 %s185_s28, 7 }
  0x1f   : > { %s3655_s4 = scalar_lea.vmem %s4702_s0, %s2637_s11  ;;  %s4613_s27 = scalar_lea.vmem [#allocation2], %s2636_s5 }
  0x20   : > { %2884 = vmatpush3.bf16.msra.mxu0 %v3286_v14  ;;  %v3664_v32 = vld [vmem:[%s3655_s4] sm:$0xf]  ;;  %v3667_v33 = vld [vmem:[%s3655_s4 + $0x4] sm:$0xf]  ;;  %v3670_v34 = vld [vmem:[%s3655_s4 + $0x8] sm:$0x1]  ;;  %s4638_s8 = scalar_lea.hbm %s4705_s3, %s2874_s16 }
  0x21   : > { %2948 = vmatpush3.bf16.msra.mxu1 %v3287_v15  ;;  %2885 = vmatprep.subr.bf16.mxu0 %v3288_v16  ;;  %v226_v35 = vshrl.u32 %v3664_v32, 16  ;;  %v229_v36 = vshll.u32 %v3664_v32, 16  ;;  %v235_v37 = vshll.u32 %v3667_v33, 16  ;;  %v239_v38 = vshrl.u32 %v3667_v33, 16  ;;  %v2646_v40 = vld [vmem:[%s3655_s4 + $0xc] sm:$0xf] }
  0x22   : > { %2949 = vmatprep.subr.bf16.mxu1 %v3289_v17  ;;  %v245_v39 = vshll.u32 %v3670_v34, 16  ;;  %v3679_v43 = vld [vmem:[%s3655_s4 + $0x10] sm:$0xf]  ;;  %v534_v44 = vshrl.u32 %v2646_v40, 16  ;;  %v537_v45 = vshll.u32 %v2646_v40, 16  ;;  %v457_v61 = vrot.slane %v3670_v34, 5 }
  0x23   : > { %v228_v41 = vrot.slane %v226_v35, 4  ;;  %v231_v42 = vrot.slane %v229_v36, 5  ;;  %v237_v46 = vrot.slane %v235_v37, 5  ;;  %v241_v47 = vrot.slane %v239_v38, 4  ;;  %v417_v49 = vld [vmem:[%s3655_s4] sm:$0xe] }
  0x24   : > { %2886 = vmatpush3.bf16.msra.mxu0 %v3290_v18  ;;  %v543_v48 = vshll.u32 %v3679_v43, 16  ;;  %v536_v51 = vrot.slane %v534_v44, 4  ;;  %v539_v52 = vrot.slane %v537_v45, 5  ;;  %v547_v53 = vshrl.u32 %v3679_v43, 16  ;;  %v3309_v14 = vld [vmem:[%s4703_s1 + $0x180] sm:$0xff]   ;;  %v3312_v16 = vld [vmem:[%s4703_s1 + $0x148] sm:$0xff]  }
  0x25   : > { %2950 = vmatpush3.bf16.msra.mxu1 %v3291_v19  ;;  %2887 = vmatprep.subr.bf16.mxu0 %v3292_v20  ;;  %v232_v50 = vor.u32 %v231_v42, %v228_v41  ;;  %v242_v56 = vor.u32 %v241_v47, %v237_v46  ;;  %v247_v57 = vrot.slane %v245_v39, 5  ;;  %v2750_v59 = vcombine.low %v2646_v40, %v3679_v43  ;;  %v3726_v15 = vld [vmem:[%s3655_s4 + $0xc] sm:$0xf]  ;;  %v3738_v20 = vld [vmem:[%s3655_s4 + $0x10] sm:$0xf]  ;;  %s2546_s29 = sshll.u32 %s4613_s27, 4  ;;  %s4640_s29 = int_to_ptr.vmem [resolvable:$true] %s2546_s29 }
  0x26   : > { %2951 = vmatprep.subr.bf16.mxu1 %v3293_v21  ;;  %v3693_v58 = vrot.slane %v543_v48, 5  ;;  %v540_v62 = vor.u32 %v539_v52, %v536_v51  ;;  %v549_v63 = vrot.slane %v547_v53, 4  ;;  %v759_v3 = vrot.slane %v3679_v43, 5  ;;  %v215_v21 = vld [vmem:[%s3655_s4 + $0x14] sm:$0x1]  ;;  %v3314_v34 = vld [vmem:[%s4703_s1 + $0x108] sm:$0xff]  }
  0x27   : > { %v233_v60 = vrot.slane %v232_v50, 4  ;;  %v243_v2 = vrot.slane %v242_v56, 4  ;;  %2142 = vmatprep.mubr.bf16.mxu1 %v2750_v59  ;;  %v2638_v4 = vrot.slane %v417_v49, 9  ;;  %v454_v5 = vrot.slane %v3667_v33, 5  ;;  %v418_v39 = vld [vmem:[%s3655_s4 + $0xc] sm:$0xe] }
  0x28   : > { %2888 = vmatpush3.bf16.msra.mxu0 %v3294_v22  ;;  %v3710_v7 = vrot.slane %v540_v62, 4  ;;  %v550_v8 = vor.u32 %v549_v63, %v3693_v58  ;;  %v2726_v11 = vcombine.low %v3664_v32, %v3667_v33  ;;  %v250_v22 = vshrl.u32 %v3726_v15, 16  ;;  %v3752_v32 = vld [vmem:[%s3655_s4 + $0x1c] sm:$0xf]  ;;  %v3315_v40 = vld [vmem:[%s4703_s1 + $0x188] sm:$0xff]   ;;  %v3319_v50 = vld [vmem:[%s4703_s1 + $0x1d0] sm:$0xff]  }
  0x29   : > { %2952 = vmatpush3.bf16.msra.mxu1 %v3295_v23  ;;  %2889 = vmatprep.subr.bf16.mxu0 %v3296_v24  ;;  %v238_v6 = vsel %vm3689_vm4, %v233_v60, %v237_v46  ;;  %v248_v10 = vsel %vm3689_vm4, %v243_v2, %v247_v57  ;;  %v455_v12 = vsel %vm3699_vm5, %v2638_v4, %v454_v5  ;;  %v456_v13 = vrot.slane %v454_v5, 4  ;;  %v3318_v46 = vld [vmem:[%s4703_s1 + $0x150] sm:$0xff]   ;;  %v3789_v2 = vld [vmem:[%s3655_s4 + $0x18] sm:$0xf]  ;;  %v3792_v4 = vld [vmem:[%s3655_s4 + $0x1c] sm:$0xf] }
  0x2a   : > { %2953 = vmatprep.subr.bf16.mxu1 %v3297_v25  ;;  %v2734_v17 = vcombine.low %v238_v6, %v248_v10  ;;  %v546_v18 = vsel %vm3689_vm4, %v3710_v7, %v3693_v58  ;;  %v3735_v19 = vrot.slane %v550_v8, 4  ;;  %v253_v24 = vshll.u32 %v3726_v15, 16  ;;  %v216_v5 = vld [vmem:[%s3655_s4 + $0x20] sm:$0x1]  ;;  %s4650_s10 = scalar_lea.sflag [#allocation3], %s185_s28  ;;  %s3368_s11 = scalar_lea.vmem %s4640_s29, 2048 }
  0x2b   : > { %v458_v23 = vsel %vm3699_vm5, %v456_v13, %v457_v61  ;;  %v259_v25 = vshll.u32 %v3738_v20, 16  ;;  %v571_v44 = vshrl.u32 %v3752_v32, 16  ;;  %v2639_v51 = vrot.slane %v418_v39, 9  ;;  %v3321_v61 = vld [vmem:[%s4703_s1 + $0x190] sm:$0xff]   ;;  %p3369_p0 = scmp.ne.s32.totalorder %s4640_s29, %s3368_s11 }
  0x2c   : > { %2890 = vmatpush3.bf16.msra.mxu0 %v3298_v26  ;;  %v263_v26 = vshrl.u32 %v3738_v20, 16  ;;  %2045 = vmatprep.mubr.bf16.mxu0 %v2734_v17  ;;  %v255_v35 = vrot.slane %v253_v24, 5  ;;  %v461_v52 = vrot.slane %v3738_v20, 5  ;;  %v464_v53 = vrot.slane %v215_v21, 5  ;;  %v419_v17 = vld [vmem:[%s3655_s4 + $0x18] sm:$0xe] }
  0x2d   : > { %2954 = vmatpush3.bf16.msra.mxu1 %v3299_v27  ;;  %2891 = vmatprep.subr.bf16.mxu0 %v3300_v28  ;;  %v2648_v27 = vld [vmem:[%s3655_s4 + $0x18] sm:$0xf]  ;;  %v3313_v28 = vld [vmem:[%s4703_s1 + $0x1c8] sm:$0xff]   ;;  %v261_v36 = vrot.slane %v259_v25, 5  ;;  %v277_v10 = vshll.u32 %v3789_v2, 16  ;;  %p3370_p1 = pnand %p3369_p0, %p3538_p3 }
  0x2e   : > { %2955 = vmatprep.subr.bf16.mxu1 %v3301_v29  ;;  %v2742_v29 = vcombine.low %v455_v12, %v458_v23  ;;  %v558_v33 = vshrl.u32 %v2648_v27, 16  ;;  %v265_v37 = vrot.slane %v263_v26, 4  ;;  %v561_v38 = vshll.u32 %v2648_v27, 16  ;;  %v3801_v12 = vld [vmem:[%s3655_s4 + $0x28] sm:$0xf] }
  0x2f   : > { %v2751_v45 = vcombine.low %v2648_v27, %v3752_v32  ;;  %v462_v59 = vsel %vm3699_vm5, %v2639_v51, %v461_v52  ;;  %v463_v60 = vrot.slane %v461_v52, 4  ;;  %p3371_p2 = pneg %p3370_p1 }
  0x30   : > { %2892 = vmatpush3.bf16.msra.mxu0 %v3302_v30  ;;  %v252_v30 = vrot.slane %v250_v22, 4  ;;  %v3761_v42 = vrot.slane %v558_v33, 4  ;;  %v266_v48 = vor.u32 %v265_v37, %v261_v36  ;;  %v3768_v49 = vrot.slane %v561_v38, 5 }
  0x31   : > { %2956 = vmatpush3.bf16.msra.mxu1 %v3303_v31  ;;  %3005 = vmatprep.subr.bf16.mxu0 %v3306_v54  ;;  %v269_v31 = vshll.u32 %v215_v21, 16  ;;  %v3320_v54 = vld [vmem:[%s4703_s1 + $0x110] sm:$0xff]   ;;  %v465_v8 = vsel %vm3699_vm5, %v463_v60, %v464_v53  ;;  %v279_v22 = vrot.slane %v277_v10, 5  ;;  %v471_v38 = vrot.slane %v216_v5, 5 }
  0x32   : > { %3069 = vmatprep.subr.bf16.mxu1 %v3307_v1  ;;  %v256_v47 = vor.u32 %v255_v35, %v252_v30  ;;  %v267_v57 = vrot.slane %v266_v48, 4  ;;  %v2727_v1 = vcombine.low %v3726_v15, %v3738_v20  ;;  %v2743_v13 = vcombine.low %v462_v59, %v465_v8  ;;  %v3324_v20 = vld [vmem:[%s4703_s1 + $0x158] sm:$0xff]  }
  0x33   : > { %2046 = vmatmul.mubr.bf16.vlgmr.msra.gmra.mrb[0].mxu0 %v2726_v11  ;;  %v271_v41 = vrot.slane %v269_v31, 5  ;;  %v2650_v11 = vld [vmem:[%s3655_s4 + $0x24] sm:$0xf]  ;;  %v287_v15 = vshrl.u32 %v3792_v4, 16  ;;  %v2640_v35 = vrot.slane %v419_v17, 9 }
  0x34   : > { %2143 = vmatmul.mubr.bf16.vlgmr.msra.gmra.mrb[0].mxu1 %v2742_v29  ;;  %3006 = vmatpush3.bf16.msra.mxu0 %v3308_v9  ;;  %v257_v56 = vrot.slane %v256_v47, 4  ;;  %v274_v9 = vshrl.u32 %v3789_v2, 16  ;;  %v582_v23 = vshrl.u32 %v2650_v11, 16  ;;  %v585_v24 = vshll.u32 %v2650_v11, 16  ;;  %v3824_v47 = vld [vmem:[%s3655_s4 + $0x28] sm:$0xf] }
  0x35   : > { %3070 = vmatpush3.bf16.msra.mxu1 %v3309_v14  ;;  %3007 = vmatprep.subr.bf16.mxu0 %v3312_v16  ;;  %v272_v63 = vsel %vm3689_vm4, %v267_v57, %v271_v41  ;;  %v283_v14 = vshll.u32 %v3792_v4, 16  ;;  %v293_v16 = vshll.u32 %v216_v5, 16  ;;  %v289_v26 = vrot.slane %v287_v15, 4  ;;  %v420_v5 = vld [vmem:[%s3655_s4 + $0x24] sm:$0xe] }
  0x36   : > { %2150 = vmatprep.mubr.bf16.mxu1 %v2751_v45  ;;  %3071 = vmatprep.subr.bf16.mxu1 %v3313_v28  ;;  %v262_v62 = vsel %vm3689_vm4, %v257_v56, %v261_v36  ;;  %v276_v21 = vrot.slane %v274_v9, 4  ;;  %v595_v28 = vshrl.u32 %v3801_v12, 16  ;;  %v3810_v30 = vrot.slane %v582_v23, 4 }
  0x37   : > { %v2735_v6 = vcombine.low %v262_v62, %v272_v63  ;;  %v285_v25 = vrot.slane %v283_v14, 5  ;;  %v295_v27 = vrot.slane %v293_v16, 5  ;;  %v3812_v31 = vrot.slane %v585_v24, 5  ;;  %v3842_v62 = vld [vmem:[%s3655_s4 + $0x34] sm:$0xf] }
  0x38   : > { %3008 = vmatpush3.bf16.msra.mxu0 %v3314_v34  ;;  %v280_v29 = vor.u32 %v279_v22, %v276_v21  ;;  %v2752_v33 = vcombine.low %v2650_v11, %v3801_v12  ;;  %v468_v36 = vrot.slane %v3792_v4, 5  ;;  %v307_v53 = vshll.u32 %v3824_v47, 16 }
  0x39   : > { %3072 = vmatpush3.bf16.msra.mxu1 %v3315_v40  ;;  %3009 = vmatprep.subr.bf16.mxu0 %v3318_v46  ;;  %v290_v34 = vor.u32 %v289_v26, %v285_v25  ;;  %v2728_v40 = vcombine.low %v3789_v2, %v3792_v4  ;;  %v3821_v46 = vld [vmem:[%s3655_s4 + $0x24] sm:$0xf]  ;;  %v311_v59 = vshrl.u32 %v3824_v47, 16  ;;  %v619_v14 = vshrl.u32 %v3842_v62, 16  ;;  %v3327_v26 = vld [vmem:[%s4703_s1 + $0x198] sm:$0xff]  }
  0x3a   : > { %3073 = vmatprep.subr.bf16.mxu1 %v3319_v50  ;;  %2053 = vmatprep.mubr.bf16.mxu0 %v2735_v6  ;;  %v281_v37 = vrot.slane %v280_v29, 4  ;;  %v469_v41 = vsel %vm3699_vm5, %v2640_v35, %v468_v36  ;;  %v470_v45 = vrot.slane %v468_v36, 4  ;;  %v217_v50 = vld [vmem:[%s3655_s4 + $0x2c] sm:$0x1]  ;;  %v298_v51 = vshrl.u32 %v3821_v46, 16  ;;  %v3330_v29 = vld [vmem:[%s4703_s1 + $0x160] sm:$0xff]  }
  0x3b   : > { %2054 = vmatmul.mubr.bf16.gmra.mrb[4].mxu0 %v2727_v1  ;;  %v291_v39 = vrot.slane %v290_v34, 4  ;;  %v301_v52 = vshll.u32 %v3821_v46, 16  ;;  %v317_v60 = vshll.u32 %v217_v50, 16  ;;  %v309_v6 = vrot.slane %v307_v53, 5 }
  0x3c   : > { %3010 = vmatpush3.bf16.msra.mxu0 %v3320_v54  ;;  %2151 = vmatmul.mubr.bf16.gmra.mrb[4].mxu1 %v2743_v13  ;;  %v286_v48 = vsel %vm3689_vm4, %v281_v37, %v285_v25  ;;  %v3325_v54 = vld [vmem:[%s4703_s1 + $0x1d8] sm:$0xff]   ;;  %v472_v57 = vsel %vm3699_vm5, %v470_v45, %v471_v38  ;;  %v300_v2 = vrot.slane %v298_v51, 4  ;;  %v313_v8 = vrot.slane %v311_v59, 4  ;;  %v3868_v37 = vld [vmem:[%s3655_s4 + $0x30] sm:$0xf] }
  0x3d   : > { %3074 = vmatpush3.bf16.msra.mxu1 %v3321_v61  ;;  %3011 = vmatprep.subr.bf16.mxu0 %v3324_v20  ;;  %v296_v56 = vsel %vm3689_vm4, %v291_v39, %v295_v27  ;;  %v2652_v61 = vld [vmem:[%s3655_s4 + $0x30] sm:$0xf]  ;;  %v2744_v1 = vcombine.low %v469_v41, %v472_v57  ;;  %v303_v4 = vrot.slane %v301_v52, 5  ;;  %v319_v9 = vrot.slane %v317_v60, 5  ;;  %v3326_v25 = vld [vmem:[%s4703_s1 + $0x118] sm:$0xff]   ;;  %v3331_v39 = vld [vmem:[%s4703_s1 + $0x1e0] sm:$0xff]  }
  0x3e   : > { %2158 = vmatprep.mubr.bf16.mxu1 %v2752_v33  ;;  %v2736_v63 = vcombine.low %v286_v48, %v296_v56  ;;  %3075 = vmatprep.subr.bf16.mxu1 %v3325_v54  ;;  %v606_v10 = vshrl.u32 %v2652_v61, 16  ;;  %v609_v13 = vshll.u32 %v2652_v61, 16  ;;  %v2753_v15 = vcombine.low %v2652_v61, %v3842_v62  ;;  %v3871_v38 = vld [vmem:[%s3655_s4 + $0x34] sm:$0xf]  ;;  %v218_v41 = vld [vmem:[%s3655_s4 + $0x38] sm:$0x1] }
  0x3f   : > { %v304_v11 = vor.u32 %v303_v4, %v300_v2  ;;  %v314_v16 = vor.u32 %v313_v8, %v309_v6  ;;  %v2641_v20 = vrot.slane %v420_v5, 9  ;;  %v475_v23 = vrot.slane %v3824_v47, 5  ;;  %v3332_v48 = vld [vmem:[%s4703_s1 + $0x120] sm:$0xff]   ;;  %v2654_v54 = vld [vmem:[%s3655_s4 + $0x3c] sm:$0xf] }
  0x40   : > { %2061 = vmatprep.mubr.bf16.mxu0 %v2736_v63  ;;  %v3847_v17 = vrot.slane %v606_v10, 4  ;;  %v3849_v22 = vrot.slane %v609_v13, 5  ;;  %v478_v24 = vrot.slane %v217_v50, 5  ;;  %v2729_v34 = vcombine.low %v3821_v46, %v3824_v47  ;;  %3012 = vmatpush3.bf16.msra.mxu0 %v3326_v25  ;;  %v3890_v56 = vld [vmem:[%s3655_s4 + $0x40] sm:$0xf] }
  0x41   : > { %v305_v21 = vrot.slane %v304_v11, 4  ;;  %v315_v27 = vrot.slane %v314_v16, 4  ;;  %v476_v35 = vsel %vm3699_vm5, %v2641_v20, %v475_v23  ;;  %v477_v36 = vrot.slane %v475_v23, 4  ;;  %3076 = vmatpush3.bf16.msra.mxu1 %v3327_v26  ;;  %3013 = vmatprep.subr.bf16.mxu0 %v3330_v29  ;;  %v421_v63 = vld [vmem:[%s3655_s4 + $0x30] sm:$0xe]  ;;  %v3336_v11 = vld [vmem:[%s4703_s1 + $0x168] sm:$0xff]  }
  0x42   : > { %v322_v45 = vshrl.u32 %v3868_v37, 16  ;;  %v325_v46 = vshll.u32 %v3868_v37, 16  ;;  %v331_v47 = vshll.u32 %v3871_v38, 16  ;;  %v335_v52 = vshrl.u32 %v3871_v38, 16  ;;  %3077 = vmatprep.subr.bf16.mxu1 %v3331_v39  ;;  %v3338_v26 = vld [vmem:[%s4703_s1 + $0x128] sm:$0xff]   ;;  %v3342_v39 = vld [vmem:[%s4703_s1 + $0x170] sm:$0xff]  }
  0x43   : > { %2062 = vmatmul.mubr.bf16.gmra.mrb[8].mxu0 %v2728_v40  ;;  %v310_v33 = vsel %vm3689_vm4, %v305_v21, %v309_v6  ;;  %v320_v40 = vsel %vm3689_vm4, %v315_v27, %v319_v9  ;;  %v479_v51 = vsel %vm3699_vm5, %v477_v36, %v478_v24  ;;  %v341_v53 = vshll.u32 %v218_v41, 16  ;;  %v3337_v21 = vld [vmem:[%s4703_s1 + $0x1e8] sm:$0xff]   ;;  %v3920_v36 = vld [vmem:[%s3655_s4 + $0x3c] sm:$0xf] }
  0x44   : > { %2159 = vmatmul.mubr.bf16.gmra.mrb[8].mxu1 %v2744_v1  ;;  %v2737_v50 = vcombine.low %v310_v33, %v320_v40  ;;  %v2745_v57 = vcombine.low %v476_v35, %v479_v51  ;;  %v324_v59 = vrot.slane %v322_v45, 4  ;;  %v327_v60 = vrot.slane %v325_v46, 5  ;;  %v3333_v1 = vld [vmem:[%s4703_s1 + $0x1a0] sm:$0xff]   ;;  %3014 = vmatpush3.bf16.msra.mxu0 %v3332_v48  ;;  %v3339_v29 = vld [vmem:[%s4703_s1 + $0x1a8] sm:$0xff]  }
  0x45   : > { %2166 = vmatprep.mubr.bf16.mxu1 %v2753_v15  ;;  %v333_v61 = vrot.slane %v331_v47, 5  ;;  %v337_v2 = vrot.slane %v335_v52, 4  ;;  %v343_v4 = vrot.slane %v341_v53, 5  ;;  %v630_v5 = vshrl.u32 %v2654_v54, 16  ;;  %3078 = vmatpush3.bf16.msra.mxu1 %v3333_v1  ;;  %v3930_v45 = vld [vmem:[%s3655_s4 + $0x40] sm:$0xf] }
  0x46   : > { %2069 = vmatprep.mubr.bf16.mxu0 %v2737_v50  ;;  %v633_v6 = vshll.u32 %v2654_v54, 16  ;;  %v328_v8 = vor.u32 %v327_v60, %v324_v59  ;;  %v643_v9 = vshrl.u32 %v3890_v56, 16  ;;  %v2754_v10 = vcombine.low %v2654_v54, %v3890_v56  ;;  %3015 = vmatprep.subr.bf16.mxu0 %v3336_v11  ;;  %v219_v46 = vld [vmem:[%s3655_s4 + $0x44] sm:$0x1]  ;;  %v2656_v54 = vld [vmem:[%s3655_s4 + $0x48] sm:$0xf] }
  0x47   : > { %v338_v13 = vor.u32 %v337_v2, %v333_v61  ;;  %v3901_v15 = vrot.slane %v630_v5, 4  ;;  %v2642_v20 = vrot.slane %v421_v63, 9  ;;  %v482_v24 = vrot.slane %v3871_v38, 5  ;;  %3079 = vmatprep.subr.bf16.mxu1 %v3337_v21  ;;  %v3343_v63 = vld [vmem:[%s4703_s1 + $0x1f0] sm:$0xff]  }
  0x48   : > { %v3903_v16 = vrot.slane %v633_v6, 5  ;;  %v329_v23 = vrot.slane %v328_v8, 4  ;;  %v485_v25 = vrot.slane %v218_v41, 5  ;;  %3016 = vmatpush3.bf16.msra.mxu0 %v3338_v26  ;;  %v2730_v41 = vcombine.low %v3868_v37, %v3871_v38 }
  0x49   : > { %v339_v27 = vrot.slane %v338_v13, 4  ;;  %v484_v35 = vrot.slane %v482_v24, 4  ;;  %v346_v47 = vshrl.u32 %v3920_v36, 16  ;;  %v349_v48 = vshll.u32 %v3920_v36, 16  ;;  %3080 = vmatpush3.bf16.msra.mxu1 %v3339_v29  ;;  %3017 = vmatprep.subr.bf16.mxu0 %v3342_v39  ;;  %v3344_v29 = vld [vmem:[%s4703_s1 + $0x130] sm:$0xff]  }
  0x4a   : > { %v334_v33 = vsel %vm3689_vm4, %v329_v23, %v333_v61  ;;  %v355_v52 = vshll.u32 %v3930_v45, 16  ;;  %v359_v53 = vshrl.u32 %v3930_v45, 16  ;;  %v365_v60 = vshll.u32 %v219_v46, 16  ;;  %v422_v61 = vld [vmem:[%s3655_s4 + $0x3c] sm:$0xe]  ;;  %3081 = vmatprep.subr.bf16.mxu1 %v3343_v63 }
  0x4b   : > { %2070 = vmatmul.mubr.bf16.gmra.mrb[12].mxu0 %v2729_v34  ;;  %v483_v34 = vsel %vm3699_vm5, %v2642_v20, %v482_v24  ;;  %v344_v40 = vsel %vm3689_vm4, %v339_v27, %v343_v4  ;;  %v486_v51 = vsel %vm3699_vm5, %v484_v35, %v485_v25  ;;  %v348_v38 = vrot.slane %v346_v47, 4  ;;  %v3345_v47 = vld [vmem:[%s4703_s1 + $0x1b0] sm:$0xff]  }
  0x4c   : > { %2167 = vmatmul.mubr.bf16.gmra.mrb[12].mxu1 %v2745_v57  ;;  %v2738_v50 = vcombine.low %v334_v33, %v344_v40  ;;  %v3941_v57 = vld [vmem:[%s3655_s4 + $0x4c] sm:$0xf]  ;;  %v2746_v37 = vcombine.low %v483_v34, %v486_v51  ;;  %v351_v59 = vrot.slane %v349_v48, 5  ;;  %v357_v1 = vrot.slane %v355_v52, 5  ;;  %3018 = vmatpush3.bf16.msra.mxu0 %v3344_v29  ;;  %v3348_v52 = vld [vmem:[%s4703_s1 + $0x178] sm:$0xff]  }
  0x4d   : > { %2174 = vmatprep.mubr.bf16.mxu1 %v2754_v10  ;;  %v361_v2 = vrot.slane %v359_v53, 4  ;;  %v654_v4 = vshrl.u32 %v2656_v54, 16  ;;  %v657_v5 = vshll.u32 %v2656_v54, 16  ;;  %v367_v8 = vrot.slane %v365_v60, 5  ;;  %v3991_v60 = vld [vmem:[%s3655_s4 + $0x58] sm:$0xf]  ;;  %3082 = vmatpush3.bf16.msra.mxu1 %v3345_v47 }
  0x4e   : > { %2077 = vmatprep.mubr.bf16.mxu0 %v2738_v50  ;;  %v352_v6 = vor.u32 %v351_v59, %v348_v38  ;;  %v2755_v11 = vcombine.low %v2656_v54, %v3941_v57  ;;  %v2643_v24 = vrot.slane %v422_v61, 9  ;;  %v489_v25 = vrot.slane %v3930_v45, 5  ;;  %v3977_v50 = vld [vmem:[%s3655_s4 + $0x50] sm:$0x1]  ;;  %v2658_v59 = vld [vmem:[%s3655_s4 + $0x54] sm:$0xf]  ;;  %3019 = vmatprep.subr.bf16.mxu0 %v3348_v52 }
  0x4f   : > { %v362_v13 = vor.u32 %v361_v2, %v357_v1  ;;  %v3949_v20 = vrot.slane %v654_v4, 4  ;;  %v3951_v21 = vrot.slane %v657_v5, 5  ;;  %v492_v26 = vrot.slane %v219_v46, 5  ;;  %v3969_v46 = vld [vmem:[%s3655_s4 + $0x4c] sm:$0xf]  ;;  %v3349_v5 = vld [vmem:[%s4703_s1 + $0x1f8] sm:$0xff]  }
  0x50   : > { %v353_v23 = vrot.slane %v352_v6, 4  ;;  %v564_v33 = vor.u32 %v3768_v49, %v3761_v42  ;;  %v2731_v35 = vcombine.low %v3920_v36, %v3930_v45  ;;  %v490_v39 = vsel %vm3699_vm5, %v2643_v24, %v489_v25  ;;  %v423_v4 = vld [vmem:[%s3655_s4 + $0x48] sm:$0xe]  ;;  %3083 = vmatprep.subr.bf16.mxu1 %v3349_v5  ;;  %v4020_v52 = vld [vmem:[%s4703_s1 + $0x200] sm:$0xff]   ;;  %v4041_v5 = vld [vmem:[%s3655_s4 + $0x58] sm:$0xf] }
  0x51   : > { %v363_v27 = vrot.slane %v362_v13, 4  ;;  %v491_v40 = vrot.slane %v489_v25, 4  ;;  %v379_v51 = vshll.u32 %v3969_v46, 16  ;;  %v389_v38 = vshll.u32 %v3977_v50, 16 }
  0x52   : > { %v358_v34 = vsel %vm3689_vm4, %v353_v23, %v357_v1  ;;  %v681_v13 = vshll.u32 %v2658_v59, 16  ;;  %v2756_v25 = vcombine.low %v2658_v59, %v3991_v60 }
  0x53   : > { %2078 = vmatmul.mubr.bf16.gmra.mrb[16].mxu0 %v2730_v41  ;;  %v3966_v41 = vld [vmem:[%s3655_s4 + $0x48] sm:$0xf]  ;;  %v368_v48 = vsel %vm3689_vm4, %v363_v27, %v367_v8  ;;  %v493_v54 = vsel %vm3699_vm5, %v491_v40, %v492_v26  ;;  %v381_v2 = vrot.slane %v379_v51, 5  ;;  %v391_v8 = vrot.slane %v389_v38, 5  ;;  %v3350_v26 = vld [vmem:[%s4703_s1 + $0x138] sm:$0xff]  }
  0x54   : > { %2175 = vmatmul.mubr.bf16.gmra.mrb[16].mxu1 %v2746_v37  ;;  %v370_v36 = vshrl.u32 %v3966_v41, 16  ;;  %v373_v45 = vshll.u32 %v3966_v41, 16  ;;  %v2739_v53 = vcombine.low %v358_v34, %v368_v48  ;;  %v383_v37 = vshrl.u32 %v3969_v46, 16  ;;  %3020 = vmatpush3.bf16.msra.mxu0 %v3350_v26 }
  0x55   : > { %2182 = vmatprep.mubr.bf16.mxu1 %v2755_v11  ;;  %v2747_v61 = vcombine.low %v490_v39, %v493_v54  ;;  %v678_v11 = vshrl.u32 %v2658_v59, 16  ;;  %v588_v27 = vor.u32 %v3812_v31, %v3810_v30  ;;  %v4006_v39 = vrot.slane %v681_v13, 5  ;;  %3149 = vmatprep.subr.bf16.mxu0 %v4020_v52 }
  0x56   : > { %v372_v63 = vrot.slane %v370_v36, 4  ;;  %v375_v1 = vrot.slane %v373_v45, 5  ;;  %2085 = vmatprep.mubr.bf16.mxu0 %v2739_v53  ;;  %v385_v6 = vrot.slane %v383_v37, 4  ;;  %v2644_v40 = vrot.slane %v423_v4, 9 }
  0x57   : > { %v4004_v34 = vrot.slane %v678_v11, 4  ;;  %v496_v48 = vrot.slane %v3969_v46, 5  ;;  %v499_v36 = vrot.slane %v3977_v50, 5  ;;  %v4015_v45 = vrot.slane %v759_v3, 4 }
  0x58   : > { %v376_v23 = vor.u32 %v375_v1, %v372_v63  ;;  %v386_v29 = vor.u32 %v385_v6, %v381_v2  ;;  %v612_v53 = vor.u32 %v3849_v22, %v3847_v17  ;;  %v636_v50 = vor.u32 %v3903_v16, %v3901_v15  ;;  %v4280_v22 = vld [vmem:[%s3655_s4 + $0x48] sm:$0xf] }
  0x59   : > { %v497_v38 = vsel %vm3699_vm5, %v2644_v40, %v496_v48  ;;  %v498_v59 = vrot.slane %v496_v48, 4  ;;  %v766_v63 = vrot.slane %v3752_v32, 5  ;;  %v2732_v4 = vcombine.low %v3966_v41, %v3969_v46  ;;  %v2660_v46 = vld [vmem:[%s3655_s4 + $0x60] sm:$0xf] }
  0x5a   : > { %v377_v47 = vrot.slane %v376_v23, 4  ;;  %v387_v51 = vrot.slane %v386_v29, 4  ;;  %v407_v41 = vshrl.u32 %v4041_v5, 16  ;;  %v702_v24 = vshrl.u32 %v2660_v46, 16 }
  0x5b   : > { %2086 = vmatmul.mubr.bf16.gmra.mrb[20].mxu0 %v2731_v35  ;;  %v3351_v35 = vld [vmem:[%s4703_s1 + $0x1b8] sm:$0xff]   ;;  %v500_v23 = vsel %vm3699_vm5, %v498_v59, %v499_v36 }
  0x5c   : > { %2183 = vmatmul.mubr.bf16.gmra.mrb[20].mxu1 %v2747_v61  ;;  %v382_v37 = vsel %vm3689_vm4, %v377_v47, %v381_v2  ;;  %v4033_v61 = vld [vmem:[%s3655_s4 + $0x54] sm:$0xf]  ;;  %v392_v1 = vsel %vm3689_vm4, %v387_v51, %v391_v8  ;;  %v221_v2 = vld [vmem:[%s3655_s4 + $0x5c] sm:$0x1]  ;;  %v403_v8 = vshll.u32 %v4041_v5, 16  ;;  %v2748_v26 = vcombine.low %v497_v38, %v500_v23 }
  0x5d   : > { %2190 = vmatprep.mubr.bf16.mxu1 %v2756_v25  ;;  %3084 = vmatpush3.bf16.msra.mxu1 %v3351_v35  ;;  %v394_v6 = vshrl.u32 %v4033_v61, 16  ;;  %v397_v11 = vshll.u32 %v4033_v61, 16  ;;  %v2740_v13 = vcombine.low %v382_v37, %v392_v1  ;;  %v4054_v25 = vld [vmem:[%s3655_s4 + $0x64] sm:$0xf]  ;;  %v413_v35 = vshll.u32 %v221_v2, 16 }
  0x5e   : > { %3181 = vmatprep.subr.bf16.mxu1 %v4020_v52  ;;  %v424_v47 = vld [vmem:[%s3655_s4 + $0x54] sm:$0xe]  ;;  %v405_v48 = vrot.slane %v403_v8, 5  ;;  %v409_v51 = vrot.slane %v407_v41, 4  ;;  %v705_v37 = vshll.u32 %v2660_v46, 16  ;;  %v715_v1 = vshrl.u32 %v4054_v25, 16 }
  0x5f   : > { %v396_v29 = vrot.slane %v394_v6, 4  ;;  %v399_v40 = vrot.slane %v397_v11, 5  ;;  %2093 = vmatprep.mubr.bf16.mxu0 %v2740_v13  ;;  %v415_v59 = vrot.slane %v413_v35, 5  ;;  %v2757_v10 = vcombine.low %v2660_v46, %v4054_v25 }
  0x60   : > { %v410_v54 = vor.u32 %v409_v51, %v405_v48  ;;  %v4059_v38 = vrot.slane %v702_v24, 4  ;;  %v4061_v6 = vrot.slane %v705_v37, 5  ;;  %v684_v11 = vor.u32 %v4006_v39, %v4004_v34  ;;  %v4086_v37 = vld [vmem:[%s3655_s4 + $0x18] sm:$0xf] }
  0x61   : > { %v400_v36 = vor.u32 %v399_v40, %v396_v29  ;;  %v503_v23 = vrot.slane %v4041_v5, 5  ;;  %v506_v8 = vrot.slane %v221_v2, 5  ;;  %v2733_v46 = vcombine.low %v4033_v61, %v4041_v5  ;;  %v2662_v2 = vld [vmem:[%s3655_s4 + $0x14] sm:$0x1] }
  0x62   : > { %v411_v41 = vrot.slane %v410_v54, 4  ;;  %v768_v24 = vrot.slane %v766_v63, 4  ;;  %v2670_v54 = vld [vmem:[%s3655_s4 + $0xc] sm:$0xe]  ;;  %v4081_v61 = vrot.slane %v564_v33, 4  ;;  %v553_v35 = vshll.u32 %v2662_v2, 16 }
  0x63   : > { %2094 = vmatmul.mubr.bf16.gmra.mrb[24].mxu0 %v2732_v4  ;;  %v401_v13 = vrot.slane %v400_v36, 4  ;;  %v2645_v4 = vrot.slane %v424_v47, 9  ;;  %v505_v40 = vrot.slane %v503_v23, 4  ;;  %v2678_v47 = vrot.slane %v2670_v54, 9 }
  0x64   : > { %2191 = vmatmul.mubr.bf16.gmra.mrb[24].mxu1 %v2748_v26  ;;  %v708_v26 = vor.u32 %v4061_v6, %v4059_v38  ;;  %v416_v5 = vsel %vm3689_vm4, %v411_v41, %v415_v59  ;;  %v762_v51 = vrot.slane %v2662_v2, 5  ;;  %v839_v42 = vshrl.u32 %v4086_v37, 16 }
  0x65   : > { %2198 = vmatprep.mubr.bf16.mxu1 %v2757_v10  ;;  %v406_v10 = vsel %vm3689_vm4, %v401_v13, %v405_v48  ;;  %v504_v29 = vsel %vm3699_vm5, %v2645_v4, %v503_v23  ;;  %v507_v36 = vsel %vm3699_vm5, %v505_v40, %v506_v8  ;;  %v4091_v13 = vld [vmem:[%s3655_s4 + $0x1c] sm:$0xf]  ;;  %v4094_v4 = vld [vmem:[%s3655_s4 + $0x20] sm:$0x1]  ;;  %v842_v49 = vshll.u32 %v4086_v37, 16 }
  0x66   : > { %v2741_v48 = vcombine.low %v406_v10, %v416_v5  ;;  %v2749_v33 = vcombine.low %v504_v29, %v507_v36  ;;  %v555_v59 = vrot.slane %v553_v35, 5  ;;  %v760_v23 = vsel %vm3699_vm5, %v2678_v47, %v759_v3  ;;  %v2663_v29 = vld [vmem:[%s3655_s4 + $0x20] sm:$0x1]  ;;  %v2671_v5 = vld [vmem:[%s3655_s4 + $0x18] sm:$0xe] }
  0x67   : > { %v763_v8 = vsel %vm3699_vm5, %v4015_v45, %v762_v51  ;;  %v841_v10 = vrot.slane %v839_v42, 4  ;;  %v844_v40 = vrot.slane %v842_v49, 5  ;;  %v848_v2 = vshll.u32 %v4091_v13, 16  ;;  %v4116_v35 = vld [vmem:[%s3655_s4 + $0x24] sm:$0xf] }
  0x68   : > { %2101 = vmatprep.mubr.bf16.mxu0 %v2741_v48  ;;  %v2766_v41 = vcombine.low %v760_v23, %v763_v8  ;;  %v852_v43 = vshrl.u32 %v4091_v13, 16  ;;  %v858_v54 = vshll.u32 %v4094_v4, 16  ;;  %v556_v3 = vsel %vm3689_vm4, %v3735_v19, %v555_v59  ;;  %v4124_v36 = vld [vmem:[%s3655_s4 + $0x28] sm:$0xf]  ;;  %v4127_v42 = vld [vmem:[%s3655_s4 + $0x2c] sm:$0x1] }
  0x69   : > { %v2774_v45 = vcombine.low %v4086_v37, %v4091_v13  ;;  %v845_v47 = vor.u32 %v844_v40, %v841_v10  ;;  %v850_v51 = vrot.slane %v848_v2, 5  ;;  %v2679_v48 = vrot.slane %v2671_v5, 9 }
  0x6a   : > { %v854_v19 = vrot.slane %v852_v43, 4  ;;  %v860_v49 = vrot.slane %v858_v54, 5  ;;  %v769_v37 = vrot.slane %v2663_v29, 5  ;;  %v866_v58 = vshll.u32 %v4116_v35, 16 }
  0x6b   : > { %2102 = vmatmul.mubr.bf16.gmra.mrb[28].mxu0 %v2733_v46  ;;  %v2758_v46 = vcombine.low %v546_v18, %v556_v3  ;;  %v846_v59 = vrot.slane %v845_v47, 4  ;;  %v767_v23 = vsel %vm3699_vm5, %v2679_v48, %v766_v63  ;;  %v872_v7 = vshll.u32 %v4124_v36, 16  ;;  %v4144_v63 = vld [vmem:[%s4703_s1 + $0x208] sm:$0xff]   ;;  %v4214_v48 = vld [vmem:[%s3655_s4 + $0x3c] sm:$0xf] }
  0x6c   : > { %2199 = vmatmul.mubr.bf16.gmra.mrb[28].mxu1 %v2749_v33  ;;  %2239 = vmatprep.mubr.bf16.mxu0 %v2766_v41  ;;  %v863_v33 = vshrl.u32 %v4116_v35, 16  ;;  %v855_v18 = vor.u32 %v854_v19, %v850_v51  ;;  %v770_v8 = vsel %vm3699_vm5, %v768_v24, %v769_v37  ;;  %v876_v10 = vshrl.u32 %v4124_v36, 16  ;;  %v4147_v3 = vld [vmem:[%s3655_s4 + $0x2c] sm:$0x1]  ;;  %v2672_v19 = vld [vmem:[%s3655_s4 + $0x24] sm:$0xe] }
  0x6d   : > { %v851_v40 = vsel %vm3689_vm4, %v846_v59, %v850_v51  ;;  %v2767_v2 = vcombine.low %v767_v23, %v770_v8  ;;  %v868_v43 = vrot.slane %v866_v58, 5  ;;  %v874_v54 = vrot.slane %v872_v7, 5  ;;  %v4160_v8 = vld [vmem:[%s3655_s4 + $0x30] sm:$0xf] }
  0x6e   : > { %v865_v41 = vrot.slane %v863_v33, 4  ;;  %v856_v5 = vrot.slane %v855_v18, 4  ;;  %v878_v47 = vrot.slane %v876_v10, 4  ;;  %v882_v24 = vshll.u32 %v4127_v42, 16 }
  0x6f   : > { %v567_v51 = vshll.u32 %v3752_v32, 16  ;;  %v573_v33 = vrot.slane %v571_v44, 4  ;;  %v577_v59 = vshll.u32 %v2663_v29, 16  ;;  %v2775_v18 = vcombine.low %v4116_v35, %v4124_v36 }
  0x70   : > { %v869_v37 = vor.u32 %v868_v43, %v865_v41  ;;  %v861_v23 = vsel %vm3689_vm4, %v856_v5, %v860_v49  ;;  %v879_v58 = vor.u32 %v878_v47, %v874_v54  ;;  %v884_v7 = vrot.slane %v882_v24, 5  ;;  %v4172_v5 = vld [vmem:[%s3655_s4 + $0x34] sm:$0xf] }
  0x71   : > { %v2782_v10 = vcombine.low %v851_v40, %v861_v23  ;;  %v569_v44 = vrot.slane %v567_v51, 5  ;;  %v579_v29 = vrot.slane %v577_v59, 5  ;;  %v2680_v41 = vrot.slane %v2672_v19, 9 }
  0x72   : > { %v870_v32 = vrot.slane %v869_v37, 4  ;;  %v880_v49 = vrot.slane %v879_v58, 4  ;;  %v773_v43 = vrot.slane %v3801_v12, 5  ;;  %v776_v40 = vrot.slane %v4147_v3, 5  ;;  %v4180_v37 = vld [vmem:[%s3655_s4 + $0x38] sm:$0x1] }
  0x73   : > { %2240 = vmatmul.mubr.bf16.vlgmr.msra.gmra.mrb[32].mxu0 %v2758_v46  ;;  %v4166_v46 = vld [vmem:[%s4703_s1 + $0x210] sm:$0xff]   ;;  %2336 = vmatprep.mubr.bf16.mxu1 %v2782_v10  ;;  %v570_v47 = vsel %vm3689_vm4, %v4081_v61, %v569_v44  ;;  %v574_v24 = vor.u32 %v573_v33, %v569_v44  ;;  %v887_v51 = vshrl.u32 %v4160_v8, 16  ;;  %v890_v58 = vshll.u32 %v4160_v8, 16  ;;  %v4200_v44 = vld [vmem:[%s4703_s1 + $0x218] sm:$0xff]  }
  0x74   : > { %3150 = vmatpush3.bf16.msra.mxu0 %v4020_v52  ;;  %2247 = vmatprep.mubr.bf16.mxu0 %v2767_v2  ;;  %v875_v2 = vsel %vm3689_vm4, %v870_v32, %v874_v54  ;;  %v885_v19 = vsel %vm3689_vm4, %v880_v49, %v884_v7  ;;  %v774_v59 = vsel %vm3699_vm5, %v2680_v41, %v773_v43  ;;  %v775_v23 = vrot.slane %v773_v43, 4 }
  0x75   : > { %3151 = vmatprep.subr.bf16.mxu0 %v4144_v63  ;;  %2337 = vmatmul.mubr.bf16.vlgmr.msra.gmra.mrb[32].mxu1 %v2774_v45  ;;  %v2783_v54 = vcombine.low %v875_v2, %v885_v19  ;;  %v575_v10 = vrot.slane %v574_v24, 4  ;;  %v889_v61 = vrot.slane %v887_v51, 4  ;;  %v896_v45 = vshll.u32 %v4172_v5, 16  ;;  %v4210_v2 = vld [vmem:[%s3655_s4 + $0x38] sm:$0x1] }
  0x76   : > { %3189 = vmatpush3.bf16.msra.mxu1 %v4020_v52  ;;  %v777_v33 = vsel %vm3699_vm5, %v775_v23, %v776_v40  ;;  %v892_v7 = vrot.slane %v890_v58, 5  ;;  %v900_v32 = vshrl.u32 %v4172_v5, 16  ;;  %v906_v52 = vshll.u32 %v4180_v37, 16  ;;  %v2673_v24 = vld [vmem:[%s3655_s4 + $0x30] sm:$0xe] }
  0x77   : > { %3182 = vmatprep.subr.bf16.mxu1 %v4144_v63  ;;  %2344 = vmatprep.mubr.bf16.mxu1 %v2783_v54  ;;  %v580_v49 = vsel %vm3689_vm4, %v575_v10, %v579_v29  ;;  %v2768_v41 = vcombine.low %v774_v59, %v777_v33  ;;  %v898_v43 = vrot.slane %v896_v45, 5  ;;  %v4207_v40 = vrot.slane %v588_v27, 4 }
  0x78   : > { %3152 = vmatpush3.bf16.msra.mxu0 %v4144_v63  ;;  %v2759_v51 = vcombine.low %v570_v47, %v580_v49  ;;  %v893_v19 = vor.u32 %v892_v7, %v889_v61  ;;  %v902_v23 = vrot.slane %v900_v32, 4  ;;  %v908_v58 = vrot.slane %v906_v52, 5  ;;  %v4233_v61 = vld [vmem:[%s3655_s4 + $0x40] sm:$0xf] }
  0x79   : > { %3153 = vmatprep.subr.bf16.mxu0 %v4166_v46  ;;  %v591_v29 = vshll.u32 %v3801_v12, 16  ;;  %v597_v59 = vrot.slane %v595_v28, 4  ;;  %v601_v30 = vshll.u32 %v4147_v3, 16  ;;  %v2776_v31 = vcombine.low %v4160_v8, %v4172_v5  ;;  %v4229_v12 = vld [vmem:[%s4703_s1 + $0x220] sm:$0xff]  }
  0x7a   : > { %3190 = vmatpush3.bf16.msra.mxu1 %v4144_v63  ;;  %v894_v27 = vrot.slane %v893_v19, 4  ;;  %v903_v47 = vor.u32 %v902_v23, %v898_v43  ;;  %v2681_v54 = vrot.slane %v2673_v24, 9  ;;  %v780_v63 = vrot.slane %v3842_v62, 5  ;;  %v4249_v24 = vld [vmem:[%s3655_s4 + $0x44] sm:$0x1] }
  0x7b   : > { %2248 = vmatmul.mubr.bf16.gmra.mrb[36].mxu0 %v2759_v51  ;;  %3183 = vmatprep.subr.bf16.mxu1 %v4166_v46  ;;  %v593_v28 = vrot.slane %v591_v29, 5  ;;  %v603_v3 = vrot.slane %v601_v30, 5  ;;  %v783_v10 = vrot.slane %v4210_v2, 5  ;;  %v911_v45 = vshrl.u32 %v4214_v48, 16 }
  0x7c   : > { %3154 = vmatpush3.bf16.msra.mxu0 %v4166_v46  ;;  %2255 = vmatprep.mubr.bf16.mxu0 %v2768_v41  ;;  %v899_v33 = vsel %vm3689_vm4, %v894_v27, %v898_v43  ;;  %v904_v7 = vrot.slane %v903_v47, 4  ;;  %v781_v32 = vsel %vm3699_vm5, %v2681_v54, %v780_v63  ;;  %v782_v52 = vrot.slane %v780_v63, 4  ;;  %v2674_v63 = vld [vmem:[%s3655_s4 + $0x3c] sm:$0xe] }
  0x7d   : > { %3155 = vmatprep.subr.bf16.mxu0 %v4200_v44  ;;  %2345 = vmatmul.mubr.bf16.gmra.mrb[36].mxu1 %v2775_v18  ;;  %v594_v49 = vsel %vm3689_vm4, %v4207_v40, %v593_v28  ;;  %v598_v41 = vor.u32 %v597_v59, %v593_v28  ;;  %v913_v51 = vrot.slane %v911_v45, 4  ;;  %v914_v35 = vshll.u32 %v4214_v48, 16 }
  0x7e   : > { %3191 = vmatpush3.bf16.msra.mxu1 %v4166_v46  ;;  %v909_v18 = vsel %vm3689_vm4, %v904_v7, %v908_v58  ;;  %v784_v43 = vsel %vm3699_vm5, %v782_v52, %v783_v10  ;;  %v920_v19 = vshll.u32 %v4233_v61, 16  ;;  %v924_v40 = vshrl.u32 %v4233_v61, 16  ;;  %v3363_v58 = vld [vmem:[%s4703_s1 + $0x228] sm:$0xff]   ;;  %v4276_v7 = vld [vmem:[%s3655_s4 + $0x44] sm:$0x1] }
  0x7f   : > { %3184 = vmatprep.subr.bf16.mxu1 %v4200_v44  ;;  %v2784_v46 = vcombine.low %v899_v33, %v909_v18  ;;  %v599_v23 = vrot.slane %v598_v41, 4  ;;  %v2769_v29 = vcombine.low %v781_v32, %v784_v43  ;;  %v916_v59 = vrot.slane %v914_v35, 5  ;;  %v4295_v18 = vld [vmem:[%s3655_s4 + $0x4c] sm:$0xf] }
  0x80   : > { %3156 = vmatpush3.bf16.msra.mxu0 %v4200_v44  ;;  %v922_v30 = vrot.slane %v920_v19, 5  ;;  %v926_v27 = vrot.slane %v924_v40, 4  ;;  %v930_v47 = vshll.u32 %v4249_v24, 16  ;;  %v613_v54 = vrot.slane %v612_v53, 4  ;;  %v4302_v40 = vld [vmem:[%s3655_s4 + $0x50] sm:$0x1] }
  0x81   : > { %3157 = vmatprep.subr.bf16.mxu0 %v4229_v12  ;;  %2352 = vmatprep.mubr.bf16.mxu1 %v2784_v46  ;;  %v604_v28 = vsel %vm3689_vm4, %v599_v23, %v603_v3  ;;  %v917_v10 = vor.u32 %v916_v59, %v913_v51  ;;  %v615_v45 = vshll.u32 %v3842_v62, 16  ;;  %v621_v33 = vrot.slane %v619_v14, 4 }
  0x82   : > { %3192 = vmatpush3.bf16.msra.mxu1 %v4200_v44  ;;  %v2760_v32 = vcombine.low %v594_v49, %v604_v28  ;;  %v927_v52 = vor.u32 %v926_v27, %v922_v30  ;;  %v932_v41 = vrot.slane %v930_v47, 5  ;;  %v625_v17 = vshll.u32 %v4210_v2, 16  ;;  %v3365_v44 = vld [vmem:[%s4703_s1 + $0x230] sm:$0xff]  }
  0x83   : > { %3185 = vmatprep.subr.bf16.mxu1 %v4229_v12  ;;  %v918_v53 = vrot.slane %v917_v10, 4  ;;  %v617_v3 = vrot.slane %v615_v45, 5  ;;  %v2777_v62 = vcombine.low %v4214_v48, %v4233_v61  ;;  %v2682_v14 = vrot.slane %v2674_v63, 9 }
  0x84   : > { %3158 = vmatpush3.bf16.msra.mxu0 %v4229_v12  ;;  %v928_v2 = vrot.slane %v927_v52, 4  ;;  %v627_v49 = vrot.slane %v625_v17, 5  ;;  %v787_v51 = vrot.slane %v3890_v56, 5  ;;  %v790_v35 = vrot.slane %v4276_v7, 5 }
  0x85   : > { %3159 = vmatprep.subr.bf16.mxu0 %v3363_v58  ;;  %2256 = vmatmul.mubr.bf16.gmra.mrb[40].mxu0 %v2760_v32  ;;  %v923_v48 = vsel %vm3689_vm4, %v918_v53, %v922_v30  ;;  %v618_v43 = vsel %vm3689_vm4, %v613_v54, %v617_v3  ;;  %v622_v19 = vor.u32 %v621_v33, %v617_v3  ;;  %v935_v8 = vshrl.u32 %v4280_v22, 16 }
  0x86   : > { %2353 = vmatmul.mubr.bf16.gmra.mrb[40].mxu1 %v2776_v31  ;;  %2263 = vmatprep.mubr.bf16.mxu0 %v2769_v29  ;;  %v933_v31 = vsel %vm3689_vm4, %v928_v2, %v932_v41  ;;  %v788_v46 = vsel %vm3699_vm5, %v2682_v14, %v787_v51  ;;  %v789_v23 = vrot.slane %v787_v51, 4  ;;  %v938_v29 = vshll.u32 %v4280_v22, 16  ;;  %v2675_v41 = vld [vmem:[%s3655_s4 + $0x48] sm:$0xe]  ;;  %v4326_v2 = vld [vmem:[%s3655_s4 + $0x50] sm:$0x1] }
  0x87   : > { %3193 = vmatpush3.bf16.msra.mxu1 %v4229_v12  ;;  %v2785_v59 = vcombine.low %v923_v48, %v933_v31  ;;  %v623_v30 = vrot.slane %v622_v19, 4  ;;  %v937_v27 = vrot.slane %v935_v8, 4  ;;  %v944_v47 = vshll.u32 %v4295_v18, 16  ;;  %v3367_v12 = vld [vmem:[%s4703_s1 + $0x238] sm:$0xff]   ;;  %v4329_v51 = vld [vmem:[%s3655_s4 + $0x54] sm:$0xf] }
  0x88   : > { %3186 = vmatprep.subr.bf16.mxu1 %v3363_v58  ;;  %3160 = vmatpush3.bf16.msra.mxu0 %v3363_v58  ;;  %v791_v54 = vsel %vm3699_vm5, %v789_v23, %v790_v35  ;;  %v940_v63 = vrot.slane %v938_v29, 5  ;;  %v948_v28 = vshrl.u32 %v4295_v18, 16  ;;  %v954_v10 = vshll.u32 %v4302_v40, 16 }
  0x89   : > { %3161 = vmatprep.subr.bf16.mxu0 %v3365_v44  ;;  %2360 = vmatprep.mubr.bf16.mxu1 %v2785_v59  ;;  %v628_v45 = vsel %vm3689_vm4, %v623_v30, %v627_v49  ;;  %v2770_v33 = vcombine.low %v788_v46, %v791_v54  ;;  %v946_v32 = vrot.slane %v944_v47, 5  ;;  %v637_v52 = vrot.slane %v636_v50, 4  ;;  %v4350_v59 = vld [vmem:[%s3655_s4 + $0x5c] sm:$0x1] }
  0x8a   : > { %v2761_v17 = vcombine.low %v618_v43, %v628_v45  ;;  %v941_v53 = vor.u32 %v940_v63, %v937_v27  ;;  %v950_v3 = vrot.slane %v948_v28, 4  ;;  %v956_v14 = vrot.slane %v954_v10, 5 }
  0x8b   : > { %3194 = vmatpush3.bf16.msra.mxu1 %v3363_v58  ;;  %v639_v49 = vshll.u32 %v3890_v56, 16  ;;  %v645_v35 = vrot.slane %v643_v9, 4  ;;  %v649_v15 = vshll.u32 %v4276_v7, 16  ;;  %v2778_v16 = vcombine.low %v4280_v22, %v4295_v18  ;;  %v4340_v9 = vld [vmem:[%s3655_s4 + $0x58] sm:$0xf] }
  0x8c   : > { %3187 = vmatprep.subr.bf16.mxu1 %v3365_v44  ;;  %3162 = vmatpush3.bf16.msra.mxu0 %v3365_v44  ;;  %v942_v50 = vrot.slane %v941_v53, 4  ;;  %v951_v58 = vor.u32 %v950_v3, %v946_v32  ;;  %v2683_v48 = vrot.slane %v2675_v41, 9  ;;  %v794_v43 = vrot.slane %v3941_v57, 5 }
  0x8d   : > { %3163 = vmatprep.subr.bf16.mxu0 %v3367_v12  ;;  %2264 = vmatmul.mubr.bf16.gmra.mrb[44].mxu0 %v2761_v17  ;;  %v641_v19 = vrot.slane %v639_v49, 5  ;;  %v651_v8 = vrot.slane %v649_v15, 5  ;;  %v797_v56 = vrot.slane %v4326_v2, 5  ;;  %v959_v7 = vshrl.u32 %v4329_v51, 16  ;;  %v2668_v15 = vld [vmem:[%s3655_s4 + $0x5c] sm:$0x1] }
  0x8e   : > { %2361 = vmatmul.mubr.bf16.gmra.mrb[44].mxu1 %v2777_v62  ;;  %2271 = vmatprep.mubr.bf16.mxu0 %v2770_v33  ;;  %v947_v22 = vsel %vm3689_vm4, %v942_v50, %v946_v32  ;;  %v952_v62 = vrot.slane %v951_v58, 4  ;;  %v795_v31 = vsel %vm3699_vm5, %v2683_v48, %v794_v43  ;;  %v796_v46 = vrot.slane %v794_v43, 4 }
  0x8f   : > { %3195 = vmatpush3.bf16.msra.mxu1 %v3365_v44  ;;  %v642_v23 = vsel %vm3689_vm4, %v637_v52, %v641_v19  ;;  %v646_v29 = vor.u32 %v645_v35, %v641_v19  ;;  %v961_v30 = vrot.slane %v959_v7, 4  ;;  %v962_v27 = vshll.u32 %v4329_v51, 16 }
  0x90   : > { %3188 = vmatprep.subr.bf16.mxu1 %v3367_v12  ;;  %3164 = vmatpush3.bf16.msra.mxu0 %v3367_v12  ;;  %v957_v44 = vsel %vm3689_vm4, %v952_v62, %v956_v14  ;;  %v798_v47 = vsel %vm3699_vm5, %v796_v46, %v797_v56  ;;  %v968_v54 = vshll.u32 %v4340_v9, 16  ;;  %v972_v63 = vshrl.u32 %v4340_v9, 16  ;;  %v4379_v46 = vld [vmem:[%s3655_s4 + $0x64] sm:$0xf] }
  0x91   : > { %v2786_v28 = vcombine.low %v947_v22, %v957_v44  ;;  %v647_v10 = vrot.slane %v646_v29, 4  ;;  %v2771_v45 = vcombine.low %v795_v31, %v798_v47  ;;  %v964_v33 = vrot.slane %v962_v27, 5 }
  0x92   : > { %v970_v32 = vrot.slane %v968_v54, 5  ;;  %v974_v52 = vrot.slane %v972_v63, 4  ;;  %v978_v41 = vshll.u32 %v4350_v59, 16  ;;  %v1102_v17 = vrot.slane %v4350_v59, 5 }
  0x93   : > { %3196 = vmatpush3.bf16.msra.mxu1 %v3367_v12  ;;  %2368 = vmatprep.mubr.bf16.mxu1 %v2786_v28  ;;  %v652_v53 = vsel %vm3689_vm4, %v647_v10, %v651_v8  ;;  %v965_v3 = vor.u32 %v964_v33, %v961_v30  ;;  %v4712_v14 = vor.u32 %v3951_v21, %v3949_v20  ;;  %v663_v35 = vshll.u32 %v3941_v57, 16  ;;  %v2676_v12 = vld [vmem:[%s3655_s4 + $0x54] sm:$0xe]  ;;  %v4375_v21 = vld [vmem:[%s3655_s4 + $0x60] sm:$0xf] }
  0x94   : > { %v2762_v50 = vcombine.low %v642_v23, %v652_v53  ;;  %v975_v58 = vor.u32 %v974_v52, %v970_v32  ;;  %v980_v48 = vrot.slane %v978_v41, 5  ;;  %v4713_v43 = vshrl.u32 %v3941_v57, 16 }
  0x95   : > { %v661_v49 = vrot.slane %v4712_v14, 4  ;;  %v966_v56 = vrot.slane %v965_v3, 4  ;;  %v665_v8 = vrot.slane %v663_v35, 5  ;;  %v673_v7 = vshll.u32 %v4326_v2, 16 }
  0x96   : > { %2369 = vmatmul.mubr.bf16.gmra.mrb[48].mxu1 %v2778_v16  ;;  %v669_v19 = vrot.slane %v4713_v43, 4  ;;  %v2779_v20 = vcombine.low %v4329_v51, %v4340_v9  ;;  %2272 = vmatmul.mubr.bf16.gmra.mrb[48].mxu0 %v2762_v50  ;;  %v976_v22 = vrot.slane %v975_v58, 4  ;;  %v2684_v62 = vrot.slane %v2676_v12, 9  ;;  %v4386_v51 = vld [vmem:[%s3655_s4 + $0x68] sm:$0x1] }
  0x97   : > { %v801_v16 = vrot.slane %v3991_v60, 5  ;;  %v804_v31 = vrot.slane %v2668_v15, 5  ;;  %2279 = vmatprep.mubr.bf16.mxu0 %v2771_v45  ;;  %v971_v57 = vsel %vm3689_vm4, %v966_v56, %v970_v32  ;;  %v666_v2 = vsel %vm3689_vm4, %v661_v49, %v665_v8  ;;  %v2677_v49 = vld [vmem:[%s3655_s4 + $0x60] sm:$0xe] }
  0x98   : > { %v670_v23 = vor.u32 %v669_v19, %v665_v8  ;;  %v675_v29 = vrot.slane %v673_v7, 5  ;;  %v981_v30 = vsel %vm3689_vm4, %v976_v22, %v980_v48  ;;  %v983_v47 = vshrl.u32 %v4375_v21, 16  ;;  %v2669_v48 = vld [vmem:[%s3655_s4 + $0x68] sm:$0x1]  ;;  %v4410_v22 = vld [vmem:[%s3655_s4 + $0x6c] sm:$0xf] }
  0x99   : > { %v802_v27 = vsel %vm3699_vm5, %v2684_v62, %v801_v16  ;;  %v803_v44 = vrot.slane %v801_v16, 4  ;;  %v2787_v54 = vcombine.low %v971_v57, %v981_v30  ;;  %v986_v28 = vshll.u32 %v4375_v21, 16 }
  0x9a   : > { %v671_v63 = vrot.slane %v670_v23, 4  ;;  %v992_v10 = vshll.u32 %v4379_v46, 16  ;;  %v985_v33 = vrot.slane %v983_v47, 4  ;;  %v996_v32 = vshrl.u32 %v4379_v46, 16 }
  0x9b   : > { %v805_v45 = vsel %vm3699_vm5, %v803_v44, %v804_v31  ;;  %v1002_v52 = vshll.u32 %v4386_v51, 16  ;;  %2376 = vmatprep.mubr.bf16.mxu1 %v2787_v54  ;;  %v988_v3 = vrot.slane %v986_v28, 5  ;;  %v685_v58 = vrot.slane %v684_v11, 4  ;;  %v4426_v44 = vld [vmem:[%s3655_s4 + $0x74] sm:$0x1] }
  0x9c   : > { %v676_v41 = vsel %vm3689_vm4, %v671_v63, %v675_v29  ;;  %v2772_v53 = vcombine.low %v802_v27, %v805_v45  ;;  %v994_v14 = vrot.slane %v992_v10, 5  ;;  %v998_v12 = vrot.slane %v996_v32, 4 }
  0x9d   : > { %v2763_v35 = vcombine.low %v666_v2, %v676_v41  ;;  %v1004_v50 = vrot.slane %v1002_v52, 5  ;;  %v989_v43 = vor.u32 %v988_v3, %v985_v33  ;;  %v687_v19 = vshll.u32 %v3991_v60, 16  ;;  %v4416_v2 = vld [vmem:[%s3655_s4 + $0x70] sm:$0xf] }
  0x9e   : > { %2377 = vmatmul.mubr.bf16.gmra.mrb[52].mxu1 %v2779_v20  ;;  %v4714_v56 = vshrl.u32 %v3991_v60, 16  ;;  %v697_v7 = vshll.u32 %v2668_v15, 16  ;;  %v999_v62 = vor.u32 %v998_v12, %v994_v14  ;;  %v2780_v20 = vcombine.low %v4375_v21, %v4379_v46 }
  0x9f   : > { %2280 = vmatmul.mubr.bf16.gmra.mrb[52].mxu0 %v2763_v35  ;;  %v2685_v16 = vrot.slane %v2677_v49, 9  ;;  %v808_v34 = vrot.slane %v4054_v25, 5  ;;  %v990_v39 = vrot.slane %v989_v43, 4  ;;  %v689_v11 = vrot.slane %v687_v19, 5  ;;  %v2710_v49 = vld [vmem:[%s3655_s4 + $0x18] sm:$0xe] }
  0xa0   : > { %v693_v8 = vrot.slane %v4714_v56, 4  ;;  %2287 = vmatprep.mubr.bf16.mxu0 %v2772_v53  ;;  %v699_v31 = vrot.slane %v697_v7, 5  ;;  %v811_v57 = vrot.slane %v2669_v48, 5  ;;  %v1000_v60 = vrot.slane %v999_v62, 4  ;;  %v2714_v7 = vld [vmem:[%s3655_s4 + $0x48] sm:$0xe] }
  0xa1   : > { %v809_v15 = vsel %vm3699_vm5, %v2685_v16, %v808_v34  ;;  %v810_v23 = vrot.slane %v808_v34, 4  ;;  %v1007_v29 = vshrl.u32 %v4410_v22, 16  ;;  %v995_v21 = vsel %vm3689_vm4, %v990_v39, %v994_v14 }
  0xa2   : > { %v690_v30 = vsel %vm3689_vm4, %v685_v58, %v689_v11  ;;  %v694_v27 = vor.u32 %v693_v8, %v689_v11  ;;  %v1010_v47 = vshll.u32 %v4410_v22, 16  ;;  %v1005_v54 = vsel %vm3689_vm4, %v1000_v60, %v1004_v50 }
  0xa3   : > { %v812_v63 = vsel %vm3699_vm5, %v810_v23, %v811_v57  ;;  %v1009_v28 = vrot.slane %v1007_v29, 4  ;;  %v1016_v10 = vshll.u32 %v4416_v2, 16  ;;  %v2788_v45 = vcombine.low %v995_v21, %v1005_v54  ;;  %v2715_v21 = vld [vmem:[%s3655_s4 + $0x54] sm:$0xe] }
  0xa4   : > { %v695_v33 = vrot.slane %v694_v27, 4  ;;  %v2773_v32 = vcombine.low %v809_v15, %v812_v63  ;;  %v1012_v52 = vrot.slane %v1010_v47, 5  ;;  %v1020_v53 = vshrl.u32 %v4416_v2, 16  ;;  %v2712_v63 = vld [vmem:[%s3655_s4 + $0x30] sm:$0xe] }
  0xa5   : > { %v1018_v41 = vrot.slane %v1016_v10, 5  ;;  %v1026_v3 = vshll.u32 %v4426_v44, 16  ;;  %v709_v14 = vrot.slane %v708_v26, 4  ;;  %2384 = vmatprep.mubr.bf16.mxu1 %v2788_v45  ;;  %v711_v50 = vshll.u32 %v4054_v25, 16  ;;  %v2716_v10 = vld [vmem:[%s3655_s4 + $0x60] sm:$0xe] }
  0xa6   : > { %v700_v35 = vsel %vm3689_vm4, %v695_v33, %v699_v31  ;;  %v1013_v12 = vor.u32 %v1012_v52, %v1009_v28  ;;  %v717_v58 = vrot.slane %v715_v1, 4  ;;  %2385 = vmatmul.mubr.bf16.gmra.mrb[56].mxu1 %v2780_v20  ;;  %v1022_v19 = vrot.slane %v1020_v53, 4  ;;  %v2711_v1 = vld [vmem:[%s3655_s4 + $0x24] sm:$0xe] }
  0xa7   : > { %v2764_v43 = vcombine.low %v690_v30, %v700_v35  ;;  %v1028_v56 = vrot.slane %v1026_v3, 5  ;;  %v721_v8 = vshll.u32 %v2669_v48, 16  ;;  %v713_v6 = vrot.slane %v711_v50, 5 }
  0xa8   : > { %v1014_v38 = vrot.slane %v1013_v12, 4  ;;  %v2781_v26 = vcombine.low %v4410_v22, %v4416_v2  ;;  %v2718_v62 = vrot.slane %v2710_v49, 9  ;;  %v1023_v16 = vor.u32 %v1022_v19, %v1018_v41 }
  0xa9   : > { %2288 = vmatmul.mubr.bf16.gmra.mrb[56].mxu0 %v2764_v43  ;;  %v723_v34 = vrot.slane %v721_v8, 5  ;;  %v1064_v39 = vrot.slane %v4091_v13, 5  ;;  %v1067_v25 = vrot.slane %v4094_v4, 5  ;;  %v714_v20 = vsel %vm3689_vm4, %v709_v14, %v713_v6 }
  0xaa   : > { %2295 = vmatprep.mubr.bf16.mxu0 %v2773_v32  ;;  %v1019_v48 = vsel %vm3689_vm4, %v1014_v38, %v1018_v41  ;;  %v718_v11 = vor.u32 %v717_v58, %v713_v6  ;;  %v2722_v22 = vrot.slane %v2714_v7, 9  ;;  %v1024_v31 = vrot.slane %v1023_v16, 4  ;;  %v2713_v58 = vld [vmem:[%s3655_s4 + $0x3c] sm:$0xe]  ;;  %v2717_v7 = vld [vmem:[%s3655_s4 + $0x6c] sm:$0xe] }
  0xab   : > { %v1065_v57 = vsel %vm3699_vm5, %v2718_v62, %v1064_v39  ;;  %v1066_v60 = vrot.slane %v1064_v39, 4  ;;  %v1092_v13 = vrot.slane %v4295_v18, 5  ;;  %v1095_v15 = vrot.slane %v4302_v40, 5  ;;  %s3372_s4 = sshll.u32 %s3464_s20, 4  ;;  %s3373_s4 = int_to_ptr.vmem [resolvable:$false] %s3372_s4 }
  0xac   : > { %v719_v4 = vrot.slane %v718_v11, 4  ;;  %v2719_v23 = vrot.slane %v2711_v1, 9  ;;  %v1071_v29 = vrot.slane %v4124_v36, 5  ;;  %v1029_v30 = vsel %vm3689_vm4, %v1024_v31, %v1028_v56  ;;  %s3374_s21 = scalar_lea.vmem %s3373_s4, 4096  ;;  %p3375_p4 = scmp.lt.s32.totalorder %s4640_s29, %s3373_s4 }
  0xad   : > { %v1068_v27 = vsel %vm3699_vm5, %v1066_v60, %v1067_v25  ;;  %v1093_v47 = vsel %vm3699_vm5, %v2722_v22, %v1092_v13  ;;  %v1094_v54 = vrot.slane %v1092_v13, 4  ;;  %v2789_v28 = vcombine.low %v1019_v48, %v1029_v30  ;;  %p3376_p5 = scmp.lt.s32.totalorder %s3374_s21, %s3368_s11 }
  0xae   : > { %v724_v18 = vsel %vm3689_vm4, %v719_v4, %v723_v34  ;;  %v2790_v40 = vcombine.low %v1065_v57, %v1068_v27  ;;  %v1072_v36 = vsel %vm3699_vm5, %v2719_v23, %v1071_v29  ;;  %v1073_v32 = vrot.slane %v1071_v29, 4  ;;  %v4515_v57 = vld [vmem:[%s4704_s2] ss:$0 sm:$0xff] }
  0xaf   : > { %v2765_v45 = vcombine.low %v714_v20, %v724_v18  ;;  %v1096_v33 = vsel %vm3699_vm5, %v1094_v54, %v1095_v15  ;;  %v2723_v52 = vrot.slane %v2715_v21, 9  ;;  %2392 = vmatprep.mubr.bf16.mxu1 %v2789_v28  ;;  %v1099_v53 = vrot.slane %v4340_v9, 5  ;;  %p3377_p6 = por %p3376_p5, %p3375_p4 }
  0xb0   : > { %v2794_v41 = vcombine.low %v1093_v47, %v1096_v33  ;;  %v2720_v3 = vrot.slane %v2712_v63, 9  ;;  %v1078_v55 = vrot.slane %v4172_v5, 5  ;;  %2393 = vmatmul.mubr.bf16.gmra.mrb[60].mxu1 %v2781_v26  ;;  %v4715_v14 = vrot.slane %v4127_v42, 5 }
  0xb1   : > { %2296 = vmatmul.mubr.bf16.gmra.mrb[60].mxu0 %v2765_v45  ;;  %v1081_v35 = vrot.slane %v4180_v37, 5  ;;  %v2724_v12 = vrot.slane %v2716_v10, 9  ;;  %v1106_v50 = vrot.slane %v4379_v46, 5  ;;  %v1100_v5 = vsel %vm3699_vm5, %v2723_v52, %v1099_v53  ;;  %p3378_p7 = pnand %p3377_p6, %p3371_p2 }
  0xb2   : > { %v1075_v49 = vsel %vm3699_vm5, %v1073_v32, %v4715_v14  ;;  %3165 = vmatprep.mubr.bf16.mxu0 %v2790_v40  ;;  %3173 = vmatprep.mubr.bf16.mxu1 %v2794_v41  ;;  %v1101_v43 = vrot.slane %v1099_v53, 4  ;;  %v1079_v42 = vsel %vm3699_vm5, %v2720_v3, %v1078_v55  ;;  %v1080_v19 = vrot.slane %v1078_v55, 4 }
  0xb3   : > { %v2791_v9 = vcombine.low %v1072_v36, %v1075_v49  ;;  %v1107_v56 = vsel %vm3699_vm5, %v2724_v12, %v1106_v50  ;;  %v1108_v8 = vrot.slane %v1106_v50, 4  ;;  %v1109_v37 = vrot.slane %v4386_v51, 5 }
  0xb4   : > { %v1103_v46 = vsel %vm3699_vm5, %v1101_v43, %v1102_v17  ;;  %v2721_v38 = vrot.slane %v2713_v58, 9  ;;  %v1085_v6 = vrot.slane %v4233_v61, 5  ;;  %v1082_v62 = vsel %vm3699_vm5, %v1080_v19, %v1081_v35 }
  0xb5   : > { %v2795_v26 = vcombine.low %v1100_v5, %v1103_v46  ;;  %v1110_v16 = vsel %vm3699_vm5, %v1108_v8, %v1109_v37  ;;  %v1088_v34 = vrot.slane %v4249_v24, 5  ;;  %v2792_v39 = vcombine.low %v1079_v42, %v1082_v62 }
  0xb6   : > { %v2796_v51 = vcombine.low %v1107_v56, %v1110_v16  ;;  %v1087_v25 = vrot.slane %v1085_v6, 4  ;;  %v2725_v1 = vrot.slane %v2717_v7, 9  ;;  %v1113_v59 = vrot.slane %v4416_v2, 5 }
  0xb7   : > { %v1116_v17 = vrot.slane %v4426_v44, 5  ;;  %v1086_v48 = vsel %vm3699_vm5, %v2721_v38, %v1085_v6 }
  0xb8   : > { %3174 = vmatmul.mubr.bf16.vlgmr.msra.gmra.mrb[64].mxu1 %v2795_v26  ;;  %v1115_v61 = vrot.slane %v1113_v59, 4  ;;  %v1089_v20 = vsel %vm3699_vm5, %v1087_v25, %v1088_v34  ;;  %v1114_v24 = vsel %vm3699_vm5, %v2725_v1, %v1113_v59 }
  0xb9   : > { %3166 = vmatmul.mubr.bf16.vlgmr.msra.gmra.mrb[64].mxu0 %v2791_v9  ;;  %3177 = vmatprep.mubr.bf16.mxu1 %v2796_v51  ;;  %v2793_v2 = vcombine.low %v1086_v48, %v1089_v20 }
  0xba   : > { %3169 = vmatprep.mubr.bf16.mxu0 %v2792_v39  ;;  %v1117_v11 = vsel %vm3699_vm5, %v1115_v61, %v1116_v17 }
  0xbb   : > { %v2797_v22 = vcombine.low %v1114_v24, %v1117_v11 }
  0xc0   : > { %3178 = vmatmul.mubr.bf16.gmra.mrb[68].mxu1 %v2797_v22 }
  0xc1   : > { %3170 = vmatmul.mubr.bf16.gmra.mrb[68].mxu0 %v2793_v2 }
 0x106   : > { %v2893_v44 = vpop.f32.mrb[0].mxu0 }
 0x107   : > { %v2957_v31 = vpop.f32.mrb[0].mxu1  ;;  %v2894_v60 = vpop.f32.mrb[1].mxu0 }
 0x108   : > { %v2895_v13 = vadd.f32 %v2894_v60, %v2893_v44  ;;  %v2958_v4 = vpop.f32.mrb[1].mxu1  ;;  %v2896_v15 = vpop.f32.mrb[2].mxu0 }
 0x109   : > { %v2959_v23 = vadd.f32 %v2958_v4, %v2957_v31  ;;  %v2960_v29 = vpop.f32.mrb[2].mxu1  ;;  %v2897_v21 = vpop.f32.mrb[3].mxu0 }
 0x10a   : > { %v2048_v0 = vadd.f32 %v2895_v13, %v4515_v57  ;;  %v2898_v30 = vadd.f32 %v2897_v21, %v2896_v15  ;;  %v2961_v27 = vpop.f32.mrb[3].mxu1 }
 0x10b   : > { %v2962_v47 = vadd.f32 %v2961_v27, %v2960_v29 }
 0x10c   : > { %v4518_v54 = vadd.f32 %v2959_v23, %v2048_v0  ;;  %v2051_v63 = vadd.f32 %v2898_v30, %v4515_v57 }
 0x10e   : > { %v4521_v28 = vadd.f32 %v2962_v47, %v2051_v63  ;;  %v2899_v18 = vpop.f32.mrb[4].mxu0 }
 0x10f   : > { %v2963_v40 = vpop.f32.mrb[4].mxu1  ;;  %v2900_v36 = vpop.f32.mrb[5].mxu0 }
 0x110   : > { %v2964_v10 = vpop.f32.mrb[5].mxu1  ;;  %v2901_v45 = vadd.f32 %v2900_v36, %v2899_v18  ;;  %v2902_v32 = vpop.f32.mrb[6].mxu0 }
 0x111   : > { %v2965_v33 = vadd.f32 %v2964_v10, %v2963_v40  ;;  %v2966_v52 = vpop.f32.mrb[6].mxu1  ;;  %v2903_v41 = vpop.f32.mrb[7].mxu0 }
 0x112   : > { %v2967_v53 = vpop.f32.mrb[7].mxu1  ;;  %v2056_v3 = vadd.f32 %v2901_v45, %v4515_v57  ;;  %v2904_v55 = vadd.f32 %v2903_v41, %v2902_v32 }
 0x113   : > { %v2968_v14 = vadd.f32 %v2967_v53, %v2966_v52 }
 0x114   : > { %v4524_v49 = vadd.f32 %v2965_v33, %v2056_v3  ;;  %v2059_v35 = vadd.f32 %v2904_v55, %v4515_v57 }
 0x116   : > { %v4527_v12 = vadd.f32 %v2968_v14, %v2059_v35  ;;  %v2905_v58 = vpop.f32.mrb[8].mxu0 }
 0x117   : > { %v2969_v50 = vpop.f32.mrb[8].mxu1  ;;  %v2906_v5 = vpop.f32.mrb[9].mxu0 }
 0x118   : > { %v2970_v9 = vpop.f32.mrb[9].mxu1  ;;  %v2907_v19 = vadd.f32 %v2906_v5, %v2905_v58  ;;  %v2908_v56 = vpop.f32.mrb[10].mxu0 }
 0x119   : > { %v2971_v43 = vadd.f32 %v2970_v9, %v2969_v50  ;;  %v2972_v42 = vpop.f32.mrb[10].mxu1  ;;  %v2909_v37 = vpop.f32.mrb[11].mxu0 }
 0x11a   : > { %v2973_v8 = vpop.f32.mrb[11].mxu1  ;;  %v2064_v46 = vadd.f32 %v2907_v19, %v4515_v57  ;;  %v2910_v38 = vadd.f32 %v2909_v37, %v2908_v56 }
 0x11b   : > { %v2974_v7 = vadd.f32 %v2973_v8, %v2972_v42 }
 0x11c   : > { %v4530_v6 = vadd.f32 %v2971_v43, %v2064_v46  ;;  %v2067_v26 = vadd.f32 %v2910_v38, %v4515_v57 }
 0x11e   : > { %v4533_v62 = vadd.f32 %v2974_v7, %v2067_v26  ;;  %v2911_v16 = vpop.f32.mrb[12].mxu0 }
 0x11f   : > { %v2975_v34 = vpop.f32.mrb[12].mxu1  ;;  %v2912_v39 = vpop.f32.mrb[13].mxu0 }
 0x120   : > { %v2976_v51 = vpop.f32.mrb[13].mxu1  ;;  %v2913_v25 = vadd.f32 %v2912_v39, %v2911_v16  ;;  %v2914_v59 = vpop.f32.mrb[14].mxu0 }
 0x121   : > { %v2977_v1 = vadd.f32 %v2976_v51, %v2975_v34  ;;  %v2978_v17 = vpop.f32.mrb[14].mxu1  ;;  %v2915_v61 = vpop.f32.mrb[15].mxu0 }
 0x122   : > { %v2979_v48 = vpop.f32.mrb[15].mxu1  ;;  %v2072_v20 = vadd.f32 %v2913_v25, %v4515_v57  ;;  %v2916_v24 = vadd.f32 %v2915_v61, %v2914_v59 }
 0x123   : > { %v2980_v11 = vadd.f32 %v2979_v48, %v2978_v17 }
 0x124   : > { %v4536_v2 = vadd.f32 %v2977_v1, %v2072_v20  ;;  %v2075_v22 = vadd.f32 %v2916_v24, %v4515_v57 }
 0x126   : > { %v4539_v44 = vadd.f32 %v2980_v11, %v2075_v22  ;;  %v2917_v31 = vpop.f32.mrb[16].mxu0 }
 0x127   : > { %v2981_v60 = vpop.f32.mrb[16].mxu1  ;;  %v2918_v13 = vpop.f32.mrb[17].mxu0 }
 0x128   : > { %v2982_v4 = vpop.f32.mrb[17].mxu1  ;;  %v2919_v15 = vadd.f32 %v2918_v13, %v2917_v31  ;;  %v2920_v29 = vpop.f32.mrb[18].mxu0 }
 0x129   : > { %v2983_v23 = vadd.f32 %v2982_v4, %v2981_v60  ;;  %v2984_v21 = vpop.f32.mrb[18].mxu1  ;;  %v2921_v0 = vpop.f32.mrb[19].mxu0 }
 0x12a   : > { %v2985_v30 = vpop.f32.mrb[19].mxu1  ;;  %v2080_v27 = vadd.f32 %v2919_v15, %v4515_v57  ;;  %v2922_v47 = vadd.f32 %v2921_v0, %v2920_v29 }
 0x12b   : > { %v2986_v63 = vadd.f32 %v2985_v30, %v2984_v21 }
 0x12c   : > { %v4542_v18 = vadd.f32 %v2983_v23, %v2080_v27  ;;  %v2083_v40 = vadd.f32 %v2922_v47, %v4515_v57 }
 0x12e   : > { %v4545_v36 = vadd.f32 %v2986_v63, %v2083_v40  ;;  %v2923_v10 = vpop.f32.mrb[20].mxu0 }
 0x12f   : > { %v2987_v45 = vpop.f32.mrb[20].mxu1  ;;  %v2924_v33 = vpop.f32.mrb[21].mxu0 }
 0x130   : > { %v2988_v32 = vpop.f32.mrb[21].mxu1  ;;  %v2925_v52 = vadd.f32 %v2924_v33, %v2923_v10  ;;  %v2926_v53 = vpop.f32.mrb[22].mxu0 }
 0x131   : > { %v2989_v41 = vadd.f32 %v2988_v32, %v2987_v45  ;;  %v2990_v3 = vpop.f32.mrb[22].mxu1  ;;  %v2927_v55 = vpop.f32.mrb[23].mxu0 }
 0x132   : > { %v2991_v14 = vpop.f32.mrb[23].mxu1  ;;  %v2088_v35 = vadd.f32 %v2925_v52, %v4515_v57  ;;  %v2928_v50 = vadd.f32 %v2927_v55, %v2926_v53 }
 0x133   : > { %v2992_v58 = vadd.f32 %v2991_v14, %v2990_v3 }
 0x134   : > { %v4548_v9 = vadd.f32 %v2989_v41, %v2088_v35  ;;  %v2091_v5 = vadd.f32 %v2928_v50, %v4515_v57 }
 0x136   : > { %v4551_v43 = vadd.f32 %v2992_v58, %v2091_v5  ;;  %v2929_v42 = vpop.f32.mrb[24].mxu0 }
 0x137   : > { %v2993_v19 = vpop.f32.mrb[24].mxu1  ;;  %v2930_v56 = vpop.f32.mrb[25].mxu0 }
 0x138   : > { %v2994_v8 = vpop.f32.mrb[25].mxu1  ;;  %v2931_v37 = vadd.f32 %v2930_v56, %v2929_v42  ;;  %v2932_v46 = vpop.f32.mrb[26].mxu0 }
 0x139   : > { %v2995_v7 = vadd.f32 %v2994_v8, %v2993_v19  ;;  %v2996_v38 = vpop.f32.mrb[26].mxu1  ;;  %v2933_v26 = vpop.f32.mrb[27].mxu0 }
 0x13a   : > { %v2997_v16 = vpop.f32.mrb[27].mxu1  ;;  %v2096_v34 = vadd.f32 %v2931_v37, %v4515_v57  ;;  %v2934_v39 = vadd.f32 %v2933_v26, %v2932_v46 }
 0x13b   : > { %v2998_v51 = vadd.f32 %v2997_v16, %v2996_v38 }
 0x13c   : > { %v4554_v25 = vadd.f32 %v2995_v7, %v2096_v34  ;;  %v2099_v1 = vadd.f32 %v2934_v39, %v4515_v57 }
 0x13e   : > { %v4557_v59 = vadd.f32 %v2998_v51, %v2099_v1  ;;  %v2935_v17 = vpop.f32.mrb[28].mxu0 }
 0x13f   : > { %v2999_v61 = vpop.f32.mrb[28].mxu1  ;;  %v2936_v48 = vpop.f32.mrb[29].mxu0 }
 0x140   : > { %v3000_v20 = vpop.f32.mrb[29].mxu1  ;;  %v2937_v24 = vadd.f32 %v2936_v48, %v2935_v17  ;;  %v2938_v22 = vpop.f32.mrb[30].mxu0 }
 0x141   : > { %v3001_v11 = vadd.f32 %v3000_v20, %v2999_v61  ;;  %v3002_v31 = vpop.f32.mrb[30].mxu1  ;;  %v2939_v60 = vpop.f32.mrb[31].mxu0 }
 0x142   : > { %v3003_v13 = vpop.f32.mrb[31].mxu1  ;;  %v2104_v4 = vadd.f32 %v2937_v24, %v4515_v57  ;;  %v2940_v15 = vadd.f32 %v2939_v60, %v2938_v22 }
 0x143   : > { %v3004_v23 = vadd.f32 %v3003_v13, %v3002_v31 }
 0x144   : > { %v4560_v29 = vadd.f32 %v3001_v11, %v2104_v4  ;;  %v2107_v21 = vadd.f32 %v2940_v15, %v4515_v57 }
 0x146   : > { %v4563_v0 = vadd.f32 %v3004_v23, %v2107_v21  ;;  %v3021_v30 = vpop.f32.mrb[32].mxu0 }
 0x147   : > { %v3022_v27 = vpop.f32.mrb[33].mxu0 }
 0x148   : > { %v3023_v47 = vadd.f32 %v3022_v27, %v3021_v30  ;;  %v3024_v63 = vpop.f32.mrb[34].mxu0  ;;  %v3085_v10 = vpop.f32.mrb[32].mxu1 }
 0x149   : > { %v3025_v40 = vpop.f32.mrb[35].mxu0  ;;  %v3086_v32 = vpop.f32.mrb[33].mxu1 }
 0x14a   : > { %v2242_v45 = vadd.f32 %v3023_v47, %v4518_v54  ;;  %v3026_v33 = vadd.f32 %v3025_v40, %v3024_v63  ;;  %v3087_v52 = vadd.f32 %v3086_v32, %v3085_v10  ;;  %v3088_v41 = vpop.f32.mrb[34].mxu1 }
 0x14b   : > { %v3089_v3 = vpop.f32.mrb[35].mxu1 }
 0x14c   : > { %v2245_v53 = vadd.f32 %v3026_v33, %v4521_v28  ;;  %v3090_v55 = vadd.f32 %v3089_v3, %v3088_v41  ;;  %v4567_v14 = vadd.f32 %v3087_v52, %v2242_v45 }
 0x14e   : > { %v3027_v57 = vpop.f32.mrb[36].mxu0  ;;  %v4569_v35 = vadd.f32 %v3090_v55, %v2245_v53 }
 0x14f   : > { %v3028_v50 = vpop.f32.mrb[37].mxu0 }
 0x150   : > { %v3091_v58 = vpop.f32.mrb[36].mxu1  ;;  %v3029_v5 = vadd.f32 %v3028_v50, %v3027_v57  ;;  %v3030_v42 = vpop.f32.mrb[38].mxu0 }
 0x151   : > { %v3092_v19 = vpop.f32.mrb[37].mxu1  ;;  %v3031_v56 = vpop.f32.mrb[39].mxu0 }
 0x152   : > { %v2250_v54 = vadd.f32 %v3029_v5, %v4524_v49  ;;  %v3093_v8 = vadd.f32 %v3092_v19, %v3091_v58  ;;  %v3094_v37 = vpop.f32.mrb[38].mxu1  ;;  %v3032_v7 = vadd.f32 %v3031_v56, %v3030_v42 }
 0x153   : > { %v3095_v46 = vpop.f32.mrb[39].mxu1 }
 0x154   : > { %v2253_v28 = vadd.f32 %v3032_v7, %v4527_v12  ;;  %v3096_v38 = vadd.f32 %v3095_v46, %v3094_v37  ;;  %v4573_v26 = vadd.f32 %v3093_v8, %v2250_v54 }
 0x156   : > { %v4575_v16 = vadd.f32 %v3096_v38, %v2253_v28 }
 0x158   : > { %v3033_v34 = vpop.f32.mrb[40].mxu0 }
 0x159   : > { %v3097_v39 = vpop.f32.mrb[40].mxu1  ;;  %v3034_v51 = vpop.f32.mrb[41].mxu0 }
 0x15a   : > { %v3098_v1 = vpop.f32.mrb[41].mxu1  ;;  %v3035_v17 = vadd.f32 %v3034_v51, %v3033_v34  ;;  %v3036_v48 = vpop.f32.mrb[42].mxu0 }
 0x15b   : > { %v3099_v61 = vadd.f32 %v3098_v1, %v3097_v39  ;;  %v3100_v20 = vpop.f32.mrb[42].mxu1  ;;  %v3037_v49 = vpop.f32.mrb[43].mxu0 }
 0x15c   : > { %v3101_v24 = vpop.f32.mrb[43].mxu1  ;;  %v2258_v11 = vadd.f32 %v3035_v17, %v4530_v6  ;;  %v3038_v22 = vadd.f32 %v3037_v49, %v3036_v48 }
 0x15d   : > { %v3102_v31 = vadd.f32 %v3101_v24, %v3100_v20 }
 0x15e   : > { %v2261_v12 = vadd.f32 %v3038_v22, %v4533_v62  ;;  %v4579_v60 = vadd.f32 %v3099_v61, %v2258_v11 }
 0x160   : > { %v3039_v13 = vpop.f32.mrb[44].mxu0  ;;  %v4581_v15 = vadd.f32 %v3102_v31, %v2261_v12 }
 0x161   : > { %v3103_v4 = vpop.f32.mrb[44].mxu1  ;;  %v3040_v23 = vpop.f32.mrb[45].mxu0 }
 0x162   : > { %v3104_v21 = vpop.f32.mrb[45].mxu1  ;;  %v3041_v30 = vadd.f32 %v3040_v23, %v3039_v13  ;;  %v3042_v47 = vpop.f32.mrb[46].mxu0 }
 0x163   : > { %v3105_v27 = vadd.f32 %v3104_v21, %v3103_v4  ;;  %v3106_v63 = vpop.f32.mrb[46].mxu1  ;;  %v3043_v40 = vpop.f32.mrb[47].mxu0 }
 0x164   : > { %v3107_v10 = vpop.f32.mrb[47].mxu1  ;;  %v2266_v6 = vadd.f32 %v3041_v30, %v4536_v2  ;;  %v3044_v45 = vadd.f32 %v3043_v40, %v3042_v47 }
 0x165   : > { %v3108_v33 = vadd.f32 %v3107_v10, %v3106_v63 }
 0x166   : > { %v2269_v62 = vadd.f32 %v3044_v45, %v4539_v44  ;;  %v4585_v32 = vadd.f32 %v3105_v27, %v2266_v6 }
 0x168   : > { %v4587_v41 = vadd.f32 %v3108_v33, %v2269_v62 }
 0x169   : > { %v3109_v52 = vpop.f32.mrb[48].mxu1  ;;  %v3045_v3 = vpop.f32.mrb[48].mxu0 }
 0x16a   : > { %v3110_v53 = vpop.f32.mrb[49].mxu1  ;;  %v3046_v50 = vpop.f32.mrb[49].mxu0 }
 0x16b   : > { %v3111_v55 = vadd.f32 %v3110_v53, %v3109_v52  ;;  %v3112_v57 = vpop.f32.mrb[50].mxu1  ;;  %v3047_v5 = vadd.f32 %v3046_v50, %v3045_v3  ;;  %v3048_v42 = vpop.f32.mrb[50].mxu0 }
 0x16c   : > { %v3113_v58 = vpop.f32.mrb[51].mxu1  ;;  %v3049_v56 = vpop.f32.mrb[51].mxu0 }
 0x16d   : > { %v3114_v19 = vadd.f32 %v3113_v58, %v3112_v57  ;;  %v2274_v2 = vadd.f32 %v3047_v5, %v4542_v18  ;;  %v3050_v54 = vadd.f32 %v3049_v56, %v3048_v42 }
 0x16f   : > { %v2277_v44 = vadd.f32 %v3050_v54, %v4545_v36  ;;  %v2371_v37 = vadd.f32 %v3111_v55, %v2274_v2 }
 0x171   : > { %v3115_v8 = vpop.f32.mrb[52].mxu1  ;;  %v4591_v34 = vadd.f32 %v3114_v19, %v2277_v44 }
 0x172   : > { %v3116_v7 = vpop.f32.mrb[53].mxu1  ;;  %v3051_v46 = vpop.f32.mrb[52].mxu0 }
 0x173   : > { %v3117_v28 = vadd.f32 %v3116_v7, %v3115_v8  ;;  %v3118_v38 = vpop.f32.mrb[54].mxu1  ;;  %v3052_v39 = vpop.f32.mrb[53].mxu0 }
 0x174   : > { %v3119_v51 = vpop.f32.mrb[55].mxu1  ;;  %v3053_v1 = vadd.f32 %v3052_v39, %v3051_v46  ;;  %v3054_v17 = vpop.f32.mrb[54].mxu0 }
 0x175   : > { %v3120_v61 = vadd.f32 %v3119_v51, %v3118_v38  ;;  %v3055_v48 = vpop.f32.mrb[55].mxu0 }
 0x176   : > { %v2282_v20 = vadd.f32 %v3053_v1, %v4548_v9  ;;  %v3056_v18 = vadd.f32 %v3055_v48, %v3054_v17 }
 0x178   : > { %v2285_v49 = vadd.f32 %v3056_v18, %v4551_v43  ;;  %v2379_v36 = vadd.f32 %v3117_v28, %v2282_v20 }
 0x179   : > { %v3121_v24 = vpop.f32.mrb[56].mxu1 }
 0x17a   : > { %v2382_v11 = vadd.f32 %v3120_v61, %v2285_v49  ;;  %v3122_v22 = vpop.f32.mrb[57].mxu1 }
 0x17b   : > { %v3123_v12 = vadd.f32 %v3122_v22, %v3121_v24  ;;  %v3124_v13 = vpop.f32.mrb[58].mxu1 }
 0x17c   : > { %v3057_v31 = vpop.f32.mrb[56].mxu0  ;;  %v3125_v23 = vpop.f32.mrb[59].mxu1 }
 0x17d   : > { %v3058_v4 = vpop.f32.mrb[57].mxu0  ;;  %v3126_v27 = vadd.f32 %v3125_v23, %v3124_v13 }
 0x17e   : > { %v3059_v21 = vadd.f32 %v3058_v4, %v3057_v31  ;;  %v3060_v30 = vpop.f32.mrb[58].mxu0 }
 0x17f   : > { %v3061_v47 = vpop.f32.mrb[59].mxu0 }
 0x180   : > { %v2290_v63 = vadd.f32 %v3059_v21, %v4554_v25  ;;  %v3062_v40 = vadd.f32 %v3061_v47, %v3060_v30 }
 0x182   : > { %v2293_v9 = vadd.f32 %v3062_v40, %v4557_v59  ;;  %v4597_v43 = vadd.f32 %v3123_v12, %v2290_v63 }
 0x183   : > { %v3127_v6 = vpop.f32.mrb[60].mxu1 }
 0x184   : > { %v3063_v10 = vpop.f32.mrb[60].mxu0  ;;  %v4599_v45 = vadd.f32 %v3126_v27, %v2293_v9  ;;  %v3128_v62 = vpop.f32.mrb[61].mxu1 }
 0x185   : > { %v3064_v33 = vpop.f32.mrb[61].mxu0  ;;  %v3129_v53 = vadd.f32 %v3128_v62, %v3127_v6  ;;  %v3130_v55 = vpop.f32.mrb[62].mxu1 }
 0x186   : > { %v3065_v52 = vadd.f32 %v3064_v33, %v3063_v10  ;;  %v3066_v3 = vpop.f32.mrb[62].mxu0  ;;  %v3131_v50 = vpop.f32.mrb[63].mxu1 }
 0x187   : > { %v3067_v57 = vpop.f32.mrb[63].mxu0  ;;  %v3132_v59 = vadd.f32 %v3131_v50, %v3130_v55 }
 0x188   : > { %v2298_v25 = vadd.f32 %v3065_v52, %v4560_v29  ;;  %v3068_v58 = vadd.f32 %v3067_v57, %v3066_v3 }
 0x18a   : > { %v2301_v5 = vadd.f32 %v3068_v58, %v4563_v0  ;;  %v2395_v42 = vadd.f32 %v3129_v53, %v2298_v25 }
 0x18b   : > { %v3175_v56 = vpop.f32.mrb[64].mxu1 }
 0x18c   : > { %v3167_v19 = vpop.f32.mrb[64].mxu0  ;;  %v2398_v2 = vadd.f32 %v3132_v59, %v2301_v5  ;;  %v2476_v44 = vadd.f32 %v3175_v56, %v2379_v36  ;;  %v2467_v7 = vpop.f32.mrb[65].mxu1 }
 0x18d   : > { %v2444_v54 = vadd.f32 %v3167_v19, %v4573_v26  ;;  %v2435_v8 = vpop.f32.mrb[65].mxu0  ;;  %v2468_v46 = vadd.f32 %v2467_v7, %v2371_v37  ;;  %v3176_v38 = vpop.f32.mrb[66].mxu1 }
 0x18e   : > { %v2436_v29 = vadd.f32 %v2435_v8, %v4567_v14  ;;  %v3168_v28 = vpop.f32.mrb[66].mxu0  ;;  %v2508_v0 = vmax.f32 %v2476_v44, 0.0  ;;  %v2479_v1 = vadd.f32 %v3176_v38, %v2382_v11  ;;  %v2470_v61 = vpop.f32.mrb[67].mxu1 }
 0x18f   : > { %v2500_v39 = vmax.f32 %v2444_v54, 0.0  ;;  %v2447_v51 = vadd.f32 %v3168_v28, %v4575_v16  ;;  %v2438_v17 = vpop.f32.mrb[67].mxu0  ;;  %v2506_v20 = vmax.f32 %v2468_v46, 0.0  ;;  %v2471_v18 = vadd.f32 %v2470_v61, %v4591_v34 }
 0x190   : > { %v2498_v48 = vmax.f32 %v2436_v29, 0.0  ;;  %v2439_v26 = vadd.f32 %v2438_v17, %v4569_v35  ;;  %2524 = vst [vmem:[%s4613_s27 + $0x50] sm:$0xff] %v2508_v0  ;;  %v2509_v16 = vmax.f32 %v2479_v1, 0.0 }
 0x191   : > { %2516 = vst [vmem:[%s4613_s27 + $0x10] sm:$0xff] %v2500_v39  ;;  %v2501_v14 = vmax.f32 %v2447_v51, 0.0  ;;  %2522 = vst [vmem:[%s4613_s27 + $0x40] sm:$0xff] %v2506_v20  ;;  %v2507_v37 = vmax.f32 %v2471_v18, 0.0 }
 0x192   : > { %2514 = vst [vmem:[%s4613_s27] sm:$0xff] %v2498_v48  ;;  %v2499_v35 = vmax.f32 %v2439_v26, 0.0  ;;  %2525 = vst [vmem:[%s4613_s27 + $0x58] sm:$0xff] %v2509_v16 }
 0x193   : > { %2517 = vst [vmem:[%s4613_s27 + $0x18] sm:$0xff] %v2501_v14  ;;  %2523 = vst [vmem:[%s4613_s27 + $0x48] sm:$0xff] %v2507_v37  ;;  %v3179_v49 = vpop.f32.mrb[68].mxu1 }
 0x194   : > { %2515 = vst [vmem:[%s4613_s27 + $0x8] sm:$0xff] %v2499_v35  ;;  %v3171_v34 = vpop.f32.mrb[68].mxu0  ;;  %v2492_v24 = vadd.f32 %v3179_v49, %v2395_v42  ;;  %v2483_v22 = vpop.f32.mrb[69].mxu1 }
 0x195   : > { %v2460_v36 = vadd.f32 %v3171_v34, %v4585_v32  ;;  %v2451_v11 = vpop.f32.mrb[69].mxu0  ;;  %v2484_v12 = vadd.f32 %v2483_v22, %v4597_v43  ;;  %v3180_v4 = vpop.f32.mrb[70].mxu1 }
 0x196   : > { %v2452_v31 = vadd.f32 %v2451_v11, %v4579_v60  ;;  %v3172_v13 = vpop.f32.mrb[70].mxu0  ;;  %v2512_v21 = vmax.f32 %v2492_v24, 0.0  ;;  %v2495_v32 = vadd.f32 %v3180_v4, %v2398_v2  ;;  %v2486_v47 = vpop.f32.mrb[71].mxu1 }
 0x197   : > { %v2504_v23 = vmax.f32 %v2460_v36, 0.0  ;;  %v2463_v30 = vadd.f32 %v3172_v13, %v4587_v41  ;;  %v2454_v27 = vpop.f32.mrb[71].mxu0  ;;  %v2510_v63 = vmax.f32 %v2484_v12, 0.0  ;;  %v2487_v9 = vadd.f32 %v2486_v47, %v4599_v45 }
 0x198   : > { %v2502_v60 = vmax.f32 %v2452_v31, 0.0  ;;  %v2455_v40 = vadd.f32 %v2454_v27, %v4581_v15  ;;  %2528 = vst [vmem:[%s4613_s27 + $0x70] sm:$0xff] %v2512_v21  ;;  %v2513_v10 = vmax.f32 %v2495_v32, 0.0 }
 0x199   : > { %2520 = vst [vmem:[%s4613_s27 + $0x30] sm:$0xff] %v2504_v23  ;;  %v2505_v43 = vmax.f32 %v2463_v30, 0.0  ;;  %2526 = vst [vmem:[%s4613_s27 + $0x60] sm:$0xff] %v2510_v63  ;;  %v2511_v41 = vmax.f32 %v2487_v9, 0.0 }
 0x19a   : > { %2518 = vst [vmem:[%s4613_s27 + $0x20] sm:$0xff] %v2502_v60  ;;  %v2503_v15 = vmax.f32 %v2455_v40, 0.0  ;;  %2529 = vst [vmem:[%s4613_s27 + $0x78] sm:$0xff] %v2513_v10 }
 0x19b   : > { %2521 = vst [vmem:[%s4613_s27 + $0x38] sm:$0xff] %v2505_v43  ;;  %2527 = vst [vmem:[%s4613_s27 + $0x68] sm:$0xff] %v2511_v41 }
 0x19c   : > { %2519 = vst [vmem:[%s4613_s27 + $0x28] sm:$0xff] %v2503_v15 }
 0x19d   : > { %3381 = shalt.err (!%p3378_p7)
}
 0x19e   : > { %s3382_s28 = scalar_lea.hbm %s4638_s8, 2048  ;;  %s3386_s24 = scalar_lea.hbm %s4705_s3, 8192 }
 0x19f   : > { %p3383_p9 = scmp.ne.s32.totalorder %s4638_s8, %s3382_s28  ;;  %p3387_p12 = scmp.lt.u32.totalorder %s4638_s8, %s4705_s3 }
 0x1a0   : > { %p3388_p13 = scmp.lt.u32.totalorder %s3386_s24, %s3382_s28  ;;  %p3390_p1 = scmp.lt.u32.totalorder %s3382_s28, %s4638_s8 }
 0x1a1   : > { %p3384_p10 = pnand %p3383_p9, %p3538_p3 }
 0x1a2   : > { %p3389_p0 = por %p3388_p13, %p3387_p12 }
 0x1a3   : > { %p3385_p11 = pneg %p3384_p10 }
 0x1a4   : > { %p3391_p2 = por %p3390_p1, %p3389_p0 }
 0x1a6   : > { %p3392_p4 = pnand %p3391_p2, %p3385_p11 }
 0x1a8   : > { %3395 = shalt.err (!%p3392_p4)
}
 0x1a9   : > { %s3465_s16 = smov 128   ;;  %s3466_s9 = smov 8  }
 0x1aa   : > { %3199 = dma.vmem_to_hbm [thread:$0]  (%p3538_p3), %s4640_s29, 2048, %s4638_s8, %s4650_s10, %s3465_s16, %s3465_s16, %s3466_s9  }
 0x1ab PF: > { %p3205_p5 = scmp.ge.s32.totalorder %s3462_s19, 2  ;;  %s2561_s7 = sand.u32 1, %s3434_s12  }
 0x1ac   : > { %s2562_s11 = scalar_lea.sflag [#allocation3], %s2561_s7 }
 0x1ad   : > { %p3202_p6 = pnand %p3205_p5, %p3547_p8 }
 0x1af   : > { %3429 = dma.done.wait (!%p3202_p6), %s2562_s11, 2048  }
 0x1b0   : > { %3431 = vsyncadd (!%p3202_p6), %s2562_s11, 4294965248  ;;  %s16_s19 = sadd.s32 1, %s3462_s19   ;;  %s4716_s12 = smov %s3438_s13 }
 0x1b1   : > { %p13_p7 = scmp.ge.s32.totalorder %s16_s19, 6   ;;  %s4717_s13 = smov %s3442_s14 }
 0x1b2   : > { %s4718_s14 = smov %s3556_s30  ;;  %s4719_s15 = smov %s3454_s17 }
 0x1b3   : > { %s4720_s16 = smov %s3458_s18  ;;  %s4721_s17 = smov %s4724_s22 }
 0x1b4   : > { %s4722_s18 = smov %s4728_s23  ;;  %15 = sbr.rel (!%p13_p7) target bundleno = 5 (0x5), region = 69 }
 0x1bb   :  { %2567 = vsyncpa [#allocation3], 1 }
 0x1bc   :  { %2569 = vsyncpa [#allocation3 + $0x1], 1 }

</bundles_post_ra>
